<compile_context>
chip_gen: v7x
topology: tpu7x:2x2x1
jax: 0.10.0
libtpu: 0.0.40
codegen_flags: <defaults>
</compile_context>

<pallas_src>
import jax
import jax.numpy as jnp
from jax import lax
from jax.experimental import pallas as pl
from jax.experimental.pallas import tpu as pltpu
import numpy as np


# ----------------------------- fused kernel ---------------------------------

def _down_kernel(x_ref, w1_ref, w2_ref, b1_ref, b2_ref, o_ref,
                 p_pad_ref, a_pad_ref):
    # x_ref  : (1, Ho, 2, Wo, 2*Cin)  NHWC input with the 2x2 pooling pairs
    #                                 pre-split (free view made in the wrapper)
    # w1_ref : (9, Cin, Mid)  bf16, conv1 weights * BN1 scale, tap-major
    # w2_ref : (9, Cout, Mid) bf16, conv2 weights * BN2 scale, tap-major
    # b1_ref : (1, Mid)   f32 folded BN1 bias
    # b2_ref : (Cout, 1)  f32 folded BN2 bias
    # o_ref  : (1, Cout, Ho*Wo)  channel-major output (NCHW via free reshape)
    # *_pad  : bf16 VMEM zero-halo buffers, interior at [1:1+Ho, 8:8+Wo, :]
    _, ho, _, wo, cin2 = x_ref.shape
    cin = cin2 // 2
    mid = b1_ref.shape[-1]
    cout = b2_ref.shape[0]
    woff = 8                                    # sublane-aligned interior col

    # ---- zero ONLY the halo border; interior is fully overwritten below -----
    def zero_halo(ref):
        hp, wp, c = ref.shape
        z_row = jnp.zeros((wp, c), ref.dtype)
        ref[0] = z_row                                             # top halo
        ref[hp - 1] = z_row                                        # bottom halo
        ref[:, 0:woff, :] = jnp.zeros((hp, woff, c), ref.dtype)    # left (aligned)
        ref[:, woff + wo:, :] = jnp.zeros((hp, wp - woff - wo, c), ref.dtype)

    zero_halo(p_pad_ref)
    zero_halo(a_pad_ref)

    # ---- MaxPool2d(2): plain elementwise maxes over the pre-split pairs -----
    xq = x_ref[0]                                        # (Ho, 2, Wo, 2*Cin)
    xh = jnp.maximum(xq[:, 0], xq[:, 1])                 # H-pool: (Ho, Wo, 2*Cin)
    pooled = jnp.maximum(xh[..., :cin], xh[..., cin:])   # W-pool: (Ho, Wo, Cin)
    p_pad_ref[1:1 + ho, woff:woff + wo, :] = pooled.astype(p_pad_ref.dtype)

    # ---- conv1 (3x3, pad=1, no bias): 9-tap accumulate + BN bias + ReLU -----
    acc1 = jnp.zeros((ho * wo, mid), jnp.float32)
    for t in range(9):                                   # static unroll
        ky, kx = divmod(t, 3)
        tap = p_pad_ref[ky:ky + ho, woff - 1 + kx:woff - 1 + kx + wo, :]
        acc1 = acc1 + jnp.dot(tap.reshape(ho * wo, cin), w1_ref[t],
                              preferred_element_type=jnp.float32)
    y1 = jnp.maximum(acc1 + b1_ref[...], 0.0)            # (Ho*Wo, Mid) f32
    a_pad_ref[1:1 + ho, woff:woff + wo, :] = (
        y1.reshape(ho, wo, mid).astype(a_pad_ref.dtype))

    # ---- conv2 (3x3, pad=1, no bias): channel-major accumulate --------------
    acc2 = jnp.zeros((cout, ho * wo), jnp.float32)
    for t in range(9):
        ky, kx = divmod(t, 3)
        tap = a_pad_ref[ky:ky + ho, woff - 1 + kx:woff - 1 + kx + wo, :]
        # (Cout, Mid) x (Ho*Wo, Mid) contracting Mid == the q @ k^T pattern,
        # giving the output directly channel-major with no transpose op.
        acc2 = acc2 + lax.dot_general(
            w2_ref[t], tap.reshape(ho * wo, mid),
            (((1,), (1,)), ((), ())), preferred_element_type=jnp.float32)
    y2 = jnp.maximum(acc2 + b2_ref[...], 0.0)            # (Cout, Ho*Wo) f32
    o_ref[0] = y2.astype(o_ref.dtype)


def down_fused(x5, w1, w2, b1, b2):
    """x5: (N, Ho, 2, Wo, 2*Cin) f32 view of the NHWC input;
       w1: (9, Cin, Mid) bf16;  w2: (9, Cout, Mid) bf16;
       b1: (1, Mid) f32;        b2: (Cout, 1) f32."""
    n, ho, _, wo, cin2 = x5.shape
    cin = cin2 // 2
    mid = w1.shape[-1]
    cout = w2.shape[1]
    wp = wo + 16                               # 8-wide aligned borders each side

    flops = 2 * n * ho * wo * 9 * (cin * mid + mid * cout)
    bytes_accessed = int(x5.size * 4 + w1.size * 2 + w2.size * 2
                         + b1.size * 4 + b2.size * 4 + n * cout * ho * wo * 4)

    return pl.pallas_call(
        _down_kernel,
        out_shape=jax.ShapeDtypeStruct((n, cout, ho * wo), jnp.float32),
        grid=(n,),
        in_specs=[
            pl.BlockSpec((1, ho, 2, wo, 2 * cin), lambda i: (i, 0, 0, 0, 0)),
            pl.BlockSpec((9, cin, mid), lambda i: (0, 0, 0)),
            pl.BlockSpec((9, cout, mid), lambda i: (0, 0, 0)),
            pl.BlockSpec((1, mid), lambda i: (0, 0)),
            pl.BlockSpec((cout, 1), lambda i: (0, 0)),
        ],
        out_specs=pl.BlockSpec((1, cout, ho * wo), lambda i: (i, 0, 0)),
        scratch_shapes=[
            pltpu.VMEM((ho + 2, wp, cin), jnp.bfloat16),   # padded pooled act
            pltpu.VMEM((ho + 2, wp, mid), jnp.bfloat16),   # padded conv1 act
        ],
        compiler_params=pltpu.CompilerParams(
            dimension_semantics=("parallel",)),            # batch -> megacore
        cost_estimate=pl.CostEstimate(flops=flops, transcendentals=0,
                                      bytes_accessed=bytes_accessed),
    )(x5, w1, w2, b1, b2)


# ------------------------------- Down module ---------------------------------

def fold_bn(gamma, beta, mean, var, eps=1e-5):
    scale = gamma / jnp.sqrt(var + eps)
    bias = beta - mean * scale
    return scale, bias


def init_down_params(key, in_channels, out_channels):
    mid = out_channels
    k1, k2, k3, k4 = jax.random.split(key, 4)
    # PyTorch conv weight layout (Cout, Cin, 3, 3) -> HWIO (3, 3, Cin, Cout)
    w1 = (0.1 * jax.random.normal(k1, (mid, in_channels, 3, 3), jnp.float32)
          ).transpose(2, 3, 1, 0)
    w2 = (0.1 * jax.random.normal(k2, (out_channels, mid, 3, 3), jnp.float32)
          ).transpose(2, 3, 1, 0)
    return {
        "w1": w1,
        "bn1_gamma": 1.0 + 0.1 * jax.random.normal(k3, (mid,), jnp.float32),
        "bn1_beta": 0.05 * jnp.arange(mid, dtype=jnp.float32),
        "bn1_mean": 0.01 * jnp.arange(mid, dtype=jnp.float32),
        "bn1_var": 1.0 + 0.02 * jnp.arange(mid, dtype=jnp.float32),
        "w2": w2,
        "bn2_gamma": 1.0 + 0.1 * jax.random.normal(k4, (out_channels,), jnp.float32),
        "bn2_beta": -0.03 * jnp.arange(out_channels, dtype=jnp.float32),
        "bn2_mean": 0.02 * jnp.arange(out_channels, dtype=jnp.float32),
        "bn2_var": 1.0 + 0.05 * jnp.arange(out_channels, dtype=jnp.float32),
    }


@jax.jit
def down_forward(x_nchw, params):
    n, cin, h, w = x_nchw.shape
    assert h % 2 == 0 and w % 2 == 0, "MaxPool2d(2) path assumes even H, W"
    mid = params["w1"].shape[-1]
    cout = params["w2"].shape[-1]
    ho, wo = h // 2, w // 2

    s1, b1 = fold_bn(params["bn1_gamma"], params["bn1_beta"],
                     params["bn1_mean"], params["bn1_var"])
    s2, b2 = fold_bn(params["bn2_gamma"], params["bn2_beta"],
                     params["bn2_mean"], params["bn2_var"])

    # BN scale folded into the (tiny) conv weights once, outside the kernel;
    # weights are bf16 MXU operands.  w1: HWIO -> (9, Cin, Mid); w2 -> (9, Cout, Mid).
    w1 = (params["w1"].reshape(9, cin, mid) * s1[None, None, :]).astype(jnp.bfloat16)
    w2 = (jnp.transpose(params["w2"], (0, 1, 3, 2)).reshape(9, cout, mid)
          * s2[None, :, None]).astype(jnp.bfloat16)

    # NCHW -> NHWC (the only input copy), then a FREE reshape pre-splitting the
    # 2x2 pooling pairs so the kernel pools with plain elementwise maxes.
    x5 = jnp.transpose(x_nchw, (0, 2, 3, 1)).reshape(n, ho, 2, wo, 2 * cin)

    out = down_fused(x5, w1, w2, b1.reshape(1, mid), b2.reshape(cout, 1))
    # (N, Cout, Ho*Wo) -> NCHW is a pure reshape: no transpose, no extra HBM pass.
    return out.reshape(n, cout, ho, wo)


# ------------------------------- Reference -----------------------------------

def down_reference(x_nchw, params):
    x = jnp.transpose(x_nchw, (0, 2, 3, 1))
    x = lax.reduce_window(x, -jnp.inf, lax.max,
                          (1, 2, 2, 1), (1, 2, 2, 1), "VALID")

    def conv_bn_relu(x, w, g, b, m, v):
        y = lax.conv_general_dilated(
            x, w, window_strides=(1, 1), padding="SAME",
            dimension_numbers=("NHWC", "HWIO", "NHWC"))
        s = g / jnp.sqrt(v + 1e-5)
        return jnp.maximum(y * s + (b - m * s), 0.0)

    x = conv_bn_relu(x, params["w1"], params["bn1_gamma"], params["bn1_beta"],
                     params["bn1_mean"], params["bn1_var"])
    x = conv_bn_relu(x, params["w2"], params["bn2_gamma"], params["bn2_beta"],
                     params["bn2_mean"], params["bn2_var"])
    return jnp.transpose(x, (0, 3, 1, 2))


# --------------------------------- Main --------------------------------------

if __name__ == "__main__":
    key = jax.random.PRNGKey(0)
    kx, kp = jax.random.split(key)

    N, Cin, H, W = 2, 4, 16, 16
    Cout = 8
    x = jax.random.normal(kx, (N, Cin, H, W), jnp.float32)   # PyTorch NCHW input
    params = init_down_params(kp, Cin, Cout)

    out = jax.block_until_ready(down_forward(x, params))
    assert out.shape == (N, Cout, H // 2, W // 2), out.shape

    ref = down_reference(x, params)
    # Tolerance accounts for bf16 MXU operands (weights + activations) vs the
    # all-f32 reference; accumulation itself is f32.
    np.testing.assert_allclose(np.asarray(out), np.asarray(ref),
                               rtol=5e-2, atol=5e-2)

    print("KERNEL_OK")
</pallas_src>

<mosaic_0001>
module attributes {stable_mosaic.version = 11 : i64} {
  func.func @_down_kernel(%arg0: i32, %arg1: memref<1x8x2x8x8xf32, #tpu.memory_space<vmem>>, %arg2: memref<9x4x8xbf16, #tpu.memory_space<vmem>>, %arg3: memref<9x8x8xbf16, #tpu.memory_space<vmem>>, %arg4: memref<1x8xf32, #tpu.memory_space<vmem>>, %arg5: memref<8x1xf32, #tpu.memory_space<vmem>>, %arg6: memref<1x8x64xf32, #tpu.memory_space<vmem>>, %arg7: memref<10x24x4xbf16, #tpu.memory_space<vmem>>, %arg8: memref<10x24x8xbf16, #tpu.memory_space<vmem>>) attributes {dimension_semantics = [#tpu.dimension_semantics<parallel>], iteration_bounds = array<i64: 2>, scalar_prefetch = 0 : i64, scratch_operands = 2 : i64, tpu.core_type = #tpu.core_type<tc>, window_params = [{transform_indices = @transform_0, window_bounds = array<i64: 1, 8, 2, 8, 8>}, {pipeline_mode = #tpu.pipeline_mode<synchronous>, transform_indices = @transform_1, window_bounds = array<i64: 9, 4, 8>}, {pipeline_mode = #tpu.pipeline_mode<synchronous>, transform_indices = @transform_2, window_bounds = array<i64: 9, 8, 8>}, {pipeline_mode = #tpu.pipeline_mode<synchronous>, transform_indices = @transform_3, window_bounds = array<i64: 1, 8>}, {pipeline_mode = #tpu.pipeline_mode<synchronous>, transform_indices = @transform_4, window_bounds = array<i64: 8, 1>}, {transform_indices = @transform_5, window_bounds = array<i64: 1, 8, 64>}]} {
    %cst = arith.constant 0.000000e+00 : bf16
    %0 = vector.broadcast %cst : bf16 to vector<24x4xbf16>
    %c0 = arith.constant 0 : index
    %c0_0 = arith.constant 0 : index
    %c0_1 = arith.constant 0 : index
    %1 = vector.load %arg7[%c0, %c0_0, %c0_1] : memref<10x24x4xbf16, #tpu.memory_space<vmem>>, vector<1x24x4xbf16>
    %2 = vector.shape_cast %1 : vector<1x24x4xbf16> to vector<24x4xbf16>
    %3 = vector.shape_cast %0 : vector<24x4xbf16> to vector<1x24x4xbf16>
    tpu.vector_store %arg7[%c0, %c0_0, %c0_1], %3 {strides = array<i32>} : memref<10x24x4xbf16, #tpu.memory_space<vmem>>, vector<1x24x4xbf16>,
    %c9 = arith.constant 9 : index
    %c0_2 = arith.constant 0 : index
    %c0_3 = arith.constant 0 : index
    %4 = vector.load %arg7[%c9, %c0_2, %c0_3] : memref<10x24x4xbf16, #tpu.memory_space<vmem>>, vector<1x24x4xbf16>
    %5 = vector.shape_cast %4 : vector<1x24x4xbf16> to vector<24x4xbf16>
    %6 = vector.shape_cast %0 : vector<24x4xbf16> to vector<1x24x4xbf16>
    tpu.vector_store %arg7[%c9, %c0_2, %c0_3], %6 {strides = array<i32>} : memref<10x24x4xbf16, #tpu.memory_space<vmem>>, vector<1x24x4xbf16>,
    %cst_4 = arith.constant 0.000000e+00 : bf16
    %7 = vector.broadcast %cst_4 : bf16 to vector<10x8x4xbf16>
    %c0_5 = arith.constant 0 : index
    %c0_6 = arith.constant 0 : index
    %c0_7 = arith.constant 0 : index
    %8 = vector.load %arg7[%c0_5, %c0_6, %c0_7] : memref<10x24x4xbf16, #tpu.memory_space<vmem>>, vector<10x8x4xbf16>
    tpu.vector_store %arg7[%c0_5, %c0_6, %c0_7], %7 {strides = array<i32>} : memref<10x24x4xbf16, #tpu.memory_space<vmem>>, vector<10x8x4xbf16>,
    %cst_8 = arith.constant 0.000000e+00 : bf16
    %9 = vector.broadcast %cst_8 : bf16 to vector<10x8x4xbf16>
    %c0_9 = arith.constant 0 : index
    %c16 = arith.constant 16 : index
    %c0_10 = arith.constant 0 : index
    %10 = vector.load %arg7[%c0_9, %c16, %c0_10] : memref<10x24x4xbf16, #tpu.memory_space<vmem>>, vector<10x8x4xbf16>
    tpu.vector_store %arg7[%c0_9, %c16, %c0_10], %9 {strides = array<i32>} : memref<10x24x4xbf16, #tpu.memory_space<vmem>>, vector<10x8x4xbf16>,
    %cst_11 = arith.constant 0.000000e+00 : bf16
    %11 = vector.broadcast %cst_11 : bf16 to vector<24x8xbf16>
    %c0_12 = arith.constant 0 : index
    %c0_13 = arith.constant 0 : index
    %c0_14 = arith.constant 0 : index
    %12 = vector.load %arg8[%c0_12, %c0_13, %c0_14] : memref<10x24x8xbf16, #tpu.memory_space<vmem>>, vector<1x24x8xbf16>
    %13 = vector.shape_cast %12 : vector<1x24x8xbf16> to vector<24x8xbf16>
    %14 = vector.shape_cast %11 : vector<24x8xbf16> to vector<1x24x8xbf16>
    tpu.vector_store %arg8[%c0_12, %c0_13, %c0_14], %14 {strides = array<i32>} : memref<10x24x8xbf16, #tpu.memory_space<vmem>>, vector<1x24x8xbf16>,
    %c9_15 = arith.constant 9 : index
    %c0_16 = arith.constant 0 : index
    %c0_17 = arith.constant 0 : index
    %15 = vector.load %arg8[%c9_15, %c0_16, %c0_17] : memref<10x24x8xbf16, #tpu.memory_space<vmem>>, vector<1x24x8xbf16>
    %16 = vector.shape_cast %15 : vector<1x24x8xbf16> to vector<24x8xbf16>
    %17 = vector.shape_cast %11 : vector<24x8xbf16> to vector<1x24x8xbf16>
    tpu.vector_store %arg8[%c9_15, %c0_16, %c0_17], %17 {strides = array<i32>} : memref<10x24x8xbf16, #tpu.memory_space<vmem>>, vector<1x24x8xbf16>,
    %cst_18 = arith.constant 0.000000e+00 : bf16
    %18 = vector.broadcast %cst_18 : bf16 to vector<10x8x8xbf16>
    %c0_19 = arith.constant 0 : index
    %c0_20 = arith.constant 0 : index
    %c0_21 = arith.constant 0 : index
    %19 = vector.load %arg8[%c0_19, %c0_20, %c0_21] : memref<10x24x8xbf16, #tpu.memory_space<vmem>>, vector<10x8x8xbf16>
    tpu.vector_store %arg8[%c0_19, %c0_20, %c0_21], %18 {strides = array<i32>} : memref<10x24x8xbf16, #tpu.memory_space<vmem>>, vector<10x8x8xbf16>,
    %cst_22 = arith.constant 0.000000e+00 : bf16
    %20 = vector.broadcast %cst_22 : bf16 to vector<10x8x8xbf16>
    %c0_23 = arith.constant 0 : index
    %c16_24 = arith.constant 16 : index
    %c0_25 = arith.constant 0 : index
    %21 = vector.load %arg8[%c0_23, %c16_24, %c0_25] : memref<10x24x8xbf16, #tpu.memory_space<vmem>>, vector<10x8x8xbf16>
    tpu.vector_store %arg8[%c0_23, %c16_24, %c0_25], %20 {strides = array<i32>} : memref<10x24x8xbf16, #tpu.memory_space<vmem>>, vector<10x8x8xbf16>,
    %c0_26 = arith.constant 0 : index
    %c0_27 = arith.constant 0 : index
    %c0_28 = arith.constant 0 : index
    %c0_29 = arith.constant 0 : index
    %c0_30 = arith.constant 0 : index
    %22 = vector.load %arg1[%c0_26, %c0_27, %c0_28, %c0_29, %c0_30] : memref<1x8x2x8x8xf32, #tpu.memory_space<vmem>>, vector<1x8x2x8x8xf32>
    %23 = vector.shape_cast %22 : vector<1x8x2x8x8xf32> to vector<8x2x8x8xf32>
    %24 = vector.extract_strided_slice %23 {offsets = [0, 0, 0, 0], sizes = [8, 1, 8, 8], strides = [1, 1, 1, 1]} : vector<8x2x8x8xf32> to vector<8x1x8x8xf32>
    %25 = vector.shape_cast %24 : vector<8x1x8x8xf32> to vector<8x8x8xf32>
    %26 = vector.extract_strided_slice %23 {offsets = [0, 1, 0, 0], sizes = [8, 1, 8, 8], strides = [1, 1, 1, 1]} : vector<8x2x8x8xf32> to vector<8x1x8x8xf32>
    %27 = vector.shape_cast %26 : vector<8x1x8x8xf32> to vector<8x8x8xf32>
    %28 = arith.maximumf %25, %27 : vector<8x8x8xf32>
    %29 = vector.extract_strided_slice %28 {offsets = [0, 0, 0], sizes = [8, 8, 4], strides = [1, 1, 1]} : vector<8x8x8xf32> to vector<8x8x4xf32>
    %30 = vector.extract_strided_slice %28 {offsets = [0, 0, 4], sizes = [8, 8, 4], strides = [1, 1, 1]} : vector<8x8x8xf32> to vector<8x8x4xf32>
    %31 = arith.maximumf %29, %30 : vector<8x8x4xf32>
    %32 = arith.truncf %31 : vector<8x8x4xf32> to vector<8x8x4xbf16>
    %c1 = arith.constant 1 : index
    %c8 = arith.constant 8 : index
    %c0_31 = arith.constant 0 : index
    %33 = vector.load %arg7[%c1, %c8, %c0_31] : memref<10x24x4xbf16, #tpu.memory_space<vmem>>, vector<8x8x4xbf16>
    tpu.vector_store %arg7[%c1, %c8, %c0_31], %32 {strides = array<i32>} : memref<10x24x4xbf16, #tpu.memory_space<vmem>>, vector<8x8x4xbf16>,
    %cst_32 = arith.constant 0.000000e+00 : f32
    %34 = vector.broadcast %cst_32 : f32 to vector<64x8xf32>
    %c0_33 = arith.constant 0 : index
    %c7 = arith.constant 7 : index
    %c0_34 = arith.constant 0 : index
    %35 = vector.load %arg7[%c0_33, %c7, %c0_34] : memref<10x24x4xbf16, #tpu.memory_space<vmem>>, vector<8x8x4xbf16>
    %36 = vector.shape_cast %35 : vector<8x8x4xbf16> to vector<64x4xbf16>
    %c0_35 = arith.constant 0 : index
    %c0_36 = arith.constant 0 : index
    %c0_37 = arith.constant 0 : index
    %37 = vector.load %arg2[%c0_35, %c0_36, %c0_37] : memref<9x4x8xbf16, #tpu.memory_space<vmem>>, vector<1x4x8xbf16>
    %38 = vector.shape_cast %37 : vector<1x4x8xbf16> to vector<4x8xbf16>
    %cst_38 = arith.constant dense<0.000000e+00> : vector<64x8xf32>
    %39 = tpu.matmul %36, %38, %cst_38 {dimension_numbers = #tpu.dot_dimension_numbers<[1], [0], [0], [1], [0, 0, 1, 1], [], []>} : vector<64x4xbf16>, vector<4x8xbf16>, vector<64x8xf32> -> vector<64x8xf32>
    %40 = arith.addf %34, %39 : vector<64x8xf32>
    %c0_39 = arith.constant 0 : index
    %c8_40 = arith.constant 8 : index
    %c0_41 = arith.constant 0 : index
    %41 = vector.load %arg7[%c0_39, %c8_40, %c0_41] : memref<10x24x4xbf16, #tpu.memory_space<vmem>>, vector<8x8x4xbf16>
    %42 = vector.shape_cast %41 : vector<8x8x4xbf16> to vector<64x4xbf16>
    %c1_42 = arith.constant 1 : index
    %c0_43 = arith.constant 0 : index
    %c0_44 = arith.constant 0 : index
    %43 = vector.load %arg2[%c1_42, %c0_43, %c0_44] : memref<9x4x8xbf16, #tpu.memory_space<vmem>>, vector<1x4x8xbf16>
    %44 = vector.shape_cast %43 : vector<1x4x8xbf16> to vector<4x8xbf16>
    %cst_45 = arith.constant dense<0.000000e+00> : vector<64x8xf32>
    %45 = tpu.matmul %42, %44, %cst_45 {dimension_numbers = #tpu.dot_dimension_numbers<[1], [0], [0], [1], [0, 0, 1, 1], [], []>} : vector<64x4xbf16>, vector<4x8xbf16>, vector<64x8xf32> -> vector<64x8xf32>
    %46 = arith.addf %40, %45 : vector<64x8xf32>
    %c0_46 = arith.constant 0 : index
    %c9_47 = arith.constant 9 : index
    %c0_48 = arith.constant 0 : index
    %47 = vector.load %arg7[%c0_46, %c9_47, %c0_48] : memref<10x24x4xbf16, #tpu.memory_space<vmem>>, vector<8x8x4xbf16>
    %48 = vector.shape_cast %47 : vector<8x8x4xbf16> to vector<64x4xbf16>
    %c2 = arith.constant 2 : index
    %c0_49 = arith.constant 0 : index
    %c0_50 = arith.constant 0 : index
    %49 = vector.load %arg2[%c2, %c0_49, %c0_50] : memref<9x4x8xbf16, #tpu.memory_space<vmem>>, vector<1x4x8xbf16>
    %50 = vector.shape_cast %49 : vector<1x4x8xbf16> to vector<4x8xbf16>
    %cst_51 = arith.constant dense<0.000000e+00> : vector<64x8xf32>
    %51 = tpu.matmul %48, %50, %cst_51 {dimension_numbers = #tpu.dot_dimension_numbers<[1], [0], [0], [1], [0, 0, 1, 1], [], []>} : vector<64x4xbf16>, vector<4x8xbf16>, vector<64x8xf32> -> vector<64x8xf32>
    %52 = arith.addf %46, %51 : vector<64x8xf32>
    %c1_52 = arith.constant 1 : index
    %c7_53 = arith.constant 7 : index
    %c0_54 = arith.constant 0 : index
    %53 = vector.load %arg7[%c1_52, %c7_53, %c0_54] : memref<10x24x4xbf16, #tpu.memory_space<vmem>>, vector<8x8x4xbf16>
    %54 = vector.shape_cast %53 : vector<8x8x4xbf16> to vector<64x4xbf16>
    %c3 = arith.constant 3 : index
    %c0_55 = arith.constant 0 : index
    %c0_56 = arith.constant 0 : index
    %55 = vector.load %arg2[%c3, %c0_55, %c0_56] : memref<9x4x8xbf16, #tpu.memory_space<vmem>>, vector<1x4x8xbf16>
    %56 = vector.shape_cast %55 : vector<1x4x8xbf16> to vector<4x8xbf16>
    %cst_57 = arith.constant dense<0.000000e+00> : vector<64x8xf32>
    %57 = tpu.matmul %54, %56, %cst_57 {dimension_numbers = #tpu.dot_dimension_numbers<[1], [0], [0], [1], [0, 0, 1, 1], [], []>} : vector<64x4xbf16>, vector<4x8xbf16>, vector<64x8xf32> -> vector<64x8xf32>
    %58 = arith.addf %52, %57 : vector<64x8xf32>
    %c1_58 = arith.constant 1 : index
    %c8_59 = arith.constant 8 : index
    %c0_60 = arith.constant 0 : index
    %59 = vector.load %arg7[%c1_58, %c8_59, %c0_60] : memref<10x24x4xbf16, #tpu.memory_space<vmem>>, vector<8x8x4xbf16>
    %60 = vector.shape_cast %59 : vector<8x8x4xbf16> to vector<64x4xbf16>
    %c4 = arith.constant 4 : index
    %c0_61 = arith.constant 0 : index
    %c0_62 = arith.constant 0 : index
    %61 = vector.load %arg2[%c4, %c0_61, %c0_62] : memref<9x4x8xbf16, #tpu.memory_space<vmem>>, vector<1x4x8xbf16>
    %62 = vector.shape_cast %61 : vector<1x4x8xbf16> to vector<4x8xbf16>
    %cst_63 = arith.constant dense<0.000000e+00> : vector<64x8xf32>
    %63 = tpu.matmul %60, %62, %cst_63 {dimension_numbers = #tpu.dot_dimension_numbers<[1], [0], [0], [1], [0, 0, 1, 1], [], []>} : vector<64x4xbf16>, vector<4x8xbf16>, vector<64x8xf32> -> vector<64x8xf32>
    %64 = arith.addf %58, %63 : vector<64x8xf32>
    %c1_64 = arith.constant 1 : index
    %c9_65 = arith.constant 9 : index
    %c0_66 = arith.constant 0 : index
    %65 = vector.load %arg7[%c1_64, %c9_65, %c0_66] : memref<10x24x4xbf16, #tpu.memory_space<vmem>>, vector<8x8x4xbf16>
    %66 = vector.shape_cast %65 : vector<8x8x4xbf16> to vector<64x4xbf16>
    %c5 = arith.constant 5 : index
    %c0_67 = arith.constant 0 : index
    %c0_68 = arith.constant 0 : index
    %67 = vector.load %arg2[%c5, %c0_67, %c0_68] : memref<9x4x8xbf16, #tpu.memory_space<vmem>>, vector<1x4x8xbf16>
    %68 = vector.shape_cast %67 : vector<1x4x8xbf16> to vector<4x8xbf16>
    %cst_69 = arith.constant dense<0.000000e+00> : vector<64x8xf32>
    %69 = tpu.matmul %66, %68, %cst_69 {dimension_numbers = #tpu.dot_dimension_numbers<[1], [0], [0], [1], [0, 0, 1, 1], [], []>} : vector<64x4xbf16>, vector<4x8xbf16>, vector<64x8xf32> -> vector<64x8xf32>
    %70 = arith.addf %64, %69 : vector<64x8xf32>
    %c2_70 = arith.constant 2 : index
    %c7_71 = arith.constant 7 : index
    %c0_72 = arith.constant 0 : index
    %71 = vector.load %arg7[%c2_70, %c7_71, %c0_72] : memref<10x24x4xbf16, #tpu.memory_space<vmem>>, vector<8x8x4xbf16>
    %72 = vector.shape_cast %71 : vector<8x8x4xbf16> to vector<64x4xbf16>
    %c6 = arith.constant 6 : index
    %c0_73 = arith.constant 0 : index
    %c0_74 = arith.constant 0 : index
    %73 = vector.load %arg2[%c6, %c0_73, %c0_74] : memref<9x4x8xbf16, #tpu.memory_space<vmem>>, vector<1x4x8xbf16>
    %74 = vector.shape_cast %73 : vector<1x4x8xbf16> to vector<4x8xbf16>
    %cst_75 = arith.constant dense<0.000000e+00> : vector<64x8xf32>
    %75 = tpu.matmul %72, %74, %cst_75 {dimension_numbers = #tpu.dot_dimension_numbers<[1], [0], [0], [1], [0, 0, 1, 1], [], []>} : vector<64x4xbf16>, vector<4x8xbf16>, vector<64x8xf32> -> vector<64x8xf32>
    %76 = arith.addf %70, %75 : vector<64x8xf32>
    %c2_76 = arith.constant 2 : index
    %c8_77 = arith.constant 8 : index
    %c0_78 = arith.constant 0 : index
    %77 = vector.load %arg7[%c2_76, %c8_77, %c0_78] : memref<10x24x4xbf16, #tpu.memory_space<vmem>>, vector<8x8x4xbf16>
    %78 = vector.shape_cast %77 : vector<8x8x4xbf16> to vector<64x4xbf16>
    %c7_79 = arith.constant 7 : index
    %c0_80 = arith.constant 0 : index
    %c0_81 = arith.constant 0 : index
    %79 = vector.load %arg2[%c7_79, %c0_80, %c0_81] : memref<9x4x8xbf16, #tpu.memory_space<vmem>>, vector<1x4x8xbf16>
    %80 = vector.shape_cast %79 : vector<1x4x8xbf16> to vector<4x8xbf16>
    %cst_82 = arith.constant dense<0.000000e+00> : vector<64x8xf32>
    %81 = tpu.matmul %78, %80, %cst_82 {dimension_numbers = #tpu.dot_dimension_numbers<[1], [0], [0], [1], [0, 0, 1, 1], [], []>} : vector<64x4xbf16>, vector<4x8xbf16>, vector<64x8xf32> -> vector<64x8xf32>
    %82 = arith.addf %76, %81 : vector<64x8xf32>
    %c2_83 = arith.constant 2 : index
    %c9_84 = arith.constant 9 : index
    %c0_85 = arith.constant 0 : index
    %83 = vector.load %arg7[%c2_83, %c9_84, %c0_85] : memref<10x24x4xbf16, #tpu.memory_space<vmem>>, vector<8x8x4xbf16>
    %84 = vector.shape_cast %83 : vector<8x8x4xbf16> to vector<64x4xbf16>
    %c8_86 = arith.constant 8 : index
    %c0_87 = arith.constant 0 : index
    %c0_88 = arith.constant 0 : index
    %85 = vector.load %arg2[%c8_86, %c0_87, %c0_88] : memref<9x4x8xbf16, #tpu.memory_space<vmem>>, vector<1x4x8xbf16>
    %86 = vector.shape_cast %85 : vector<1x4x8xbf16> to vector<4x8xbf16>
    %cst_89 = arith.constant dense<0.000000e+00> : vector<64x8xf32>
    %87 = tpu.matmul %84, %86, %cst_89 {dimension_numbers = #tpu.dot_dimension_numbers<[1], [0], [0], [1], [0, 0, 1, 1], [], []>} : vector<64x4xbf16>, vector<4x8xbf16>, vector<64x8xf32> -> vector<64x8xf32>
    %88 = arith.addf %82, %87 : vector<64x8xf32>
    %c0_90 = arith.constant 0 : index
    %c0_91 = arith.constant 0 : index
    %89 = vector.load %arg4[%c0_90, %c0_91] : memref<1x8xf32, #tpu.memory_space<vmem>>, vector<1x8xf32>
    %90 = vector.broadcast %89 : vector<1x8xf32> to vector<64x8xf32>
    %91 = arith.addf %88, %90 : vector<64x8xf32>
    %cst_92 = arith.constant 0.000000e+00 : f32
    %92 = vector.broadcast %cst_92 : f32 to vector<64x8xf32>
    %93 = arith.maximumf %91, %92 : vector<64x8xf32>
    %94 = vector.shape_cast %93 : vector<64x8xf32> to vector<8x8x8xf32>
    %95 = arith.truncf %94 : vector<8x8x8xf32> to vector<8x8x8xbf16>
    %c1_93 = arith.constant 1 : index
    %c8_94 = arith.constant 8 : index
    %c0_95 = arith.constant 0 : index
    %96 = vector.load %arg8[%c1_93, %c8_94, %c0_95] : memref<10x24x8xbf16, #tpu.memory_space<vmem>>, vector<8x8x8xbf16>
    tpu.vector_store %arg8[%c1_93, %c8_94, %c0_95], %95 {strides = array<i32>} : memref<10x24x8xbf16, #tpu.memory_space<vmem>>, vector<8x8x8xbf16>,
    %cst_96 = arith.constant 0.000000e+00 : f32
    %97 = vector.broadcast %cst_96 : f32 to vector<8x64xf32>
    %c0_97 = arith.constant 0 : index
    %c7_98 = arith.constant 7 : index
    %c0_99 = arith.constant 0 : index
    %98 = vector.load %arg8[%c0_97, %c7_98, %c0_99] : memref<10x24x8xbf16, #tpu.memory_space<vmem>>, vector<8x8x8xbf16>
    %c0_100 = arith.constant 0 : index
    %c0_101 = arith.constant 0 : index
    %c0_102 = arith.constant 0 : index
    %99 = vector.load %arg3[%c0_100, %c0_101, %c0_102] : memref<9x8x8xbf16, #tpu.memory_space<vmem>>, vector<1x8x8xbf16>
    %100 = vector.shape_cast %99 : vector<1x8x8xbf16> to vector<8x8xbf16>
    %101 = vector.shape_cast %98 : vector<8x8x8xbf16> to vector<64x8xbf16>
    %cst_103 = arith.constant dense<0.000000e+00> : vector<8x64xf32>
    %102 = tpu.matmul %100, %101, %cst_103 {dimension_numbers = #tpu.dot_dimension_numbers<[1], [1], [0], [0], [0, 0, 1, 0], [], []>} : vector<8x8xbf16>, vector<64x8xbf16>, vector<8x64xf32> -> vector<8x64xf32>
    %103 = arith.addf %97, %102 : vector<8x64xf32>
    %c0_104 = arith.constant 0 : index
    %c8_105 = arith.constant 8 : index
    %c0_106 = arith.constant 0 : index
    %104 = vector.load %arg8[%c0_104, %c8_105, %c0_106] : memref<10x24x8xbf16, #tpu.memory_space<vmem>>, vector<8x8x8xbf16>
    %c1_107 = arith.constant 1 : index
    %c0_108 = arith.constant 0 : index
    %c0_109 = arith.constant 0 : index
    %105 = vector.load %arg3[%c1_107, %c0_108, %c0_109] : memref<9x8x8xbf16, #tpu.memory_space<vmem>>, vector<1x8x8xbf16>
    %106 = vector.shape_cast %105 : vector<1x8x8xbf16> to vector<8x8xbf16>
    %107 = vector.shape_cast %104 : vector<8x8x8xbf16> to vector<64x8xbf16>
    %cst_110 = arith.constant dense<0.000000e+00> : vector<8x64xf32>
    %108 = tpu.matmul %106, %107, %cst_110 {dimension_numbers = #tpu.dot_dimension_numbers<[1], [1], [0], [0], [0, 0, 1, 0], [], []>} : vector<8x8xbf16>, vector<64x8xbf16>, vector<8x64xf32> -> vector<8x64xf32>
    %109 = arith.addf %103, %108 : vector<8x64xf32>
    %c0_111 = arith.constant 0 : index
    %c9_112 = arith.constant 9 : index
    %c0_113 = arith.constant 0 : index
    %110 = vector.load %arg8[%c0_111, %c9_112, %c0_113] : memref<10x24x8xbf16, #tpu.memory_space<vmem>>, vector<8x8x8xbf16>
    %c2_114 = arith.constant 2 : index
    %c0_115 = arith.constant 0 : index
    %c0_116 = arith.constant 0 : index
    %111 = vector.load %arg3[%c2_114, %c0_115, %c0_116] : memref<9x8x8xbf16, #tpu.memory_space<vmem>>, vector<1x8x8xbf16>
    %112 = vector.shape_cast %111 : vector<1x8x8xbf16> to vector<8x8xbf16>
    %113 = vector.shape_cast %110 : vector<8x8x8xbf16> to vector<64x8xbf16>
    %cst_117 = arith.constant dense<0.000000e+00> : vector<8x64xf32>
    %114 = tpu.matmul %112, %113, %cst_117 {dimension_numbers = #tpu.dot_dimension_numbers<[1], [1], [0], [0], [0, 0, 1, 0], [], []>} : vector<8x8xbf16>, vector<64x8xbf16>, vector<8x64xf32> -> vector<8x64xf32>
    %115 = arith.addf %109, %114 : vector<8x64xf32>
    %c1_118 = arith.constant 1 : index
    %c7_119 = arith.constant 7 : index
    %c0_120 = arith.constant 0 : index
    %116 = vector.load %arg8[%c1_118, %c7_119, %c0_120] : memref<10x24x8xbf16, #tpu.memory_space<vmem>>, vector<8x8x8xbf16>
    %c3_121 = arith.constant 3 : index
    %c0_122 = arith.constant 0 : index
    %c0_123 = arith.constant 0 : index
    %117 = vector.load %arg3[%c3_121, %c0_122, %c0_123] : memref<9x8x8xbf16, #tpu.memory_space<vmem>>, vector<1x8x8xbf16>
    %118 = vector.shape_cast %117 : vector<1x8x8xbf16> to vector<8x8xbf16>
    %119 = vector.shape_cast %116 : vector<8x8x8xbf16> to vector<64x8xbf16>
    %cst_124 = arith.constant dense<0.000000e+00> : vector<8x64xf32>
    %120 = tpu.matmul %118, %119, %cst_124 {dimension_numbers = #tpu.dot_dimension_numbers<[1], [1], [0], [0], [0, 0, 1, 0], [], []>} : vector<8x8xbf16>, vector<64x8xbf16>, vector<8x64xf32> -> vector<8x64xf32>
    %121 = arith.addf %115, %120 : vector<8x64xf32>
    %c1_125 = arith.constant 1 : index
    %c8_126 = arith.constant 8 : index
    %c0_127 = arith.constant 0 : index
    %122 = vector.load %arg8[%c1_125, %c8_126, %c0_127] : memref<10x24x8xbf16, #tpu.memory_space<vmem>>, vector<8x8x8xbf16>
    %c4_128 = arith.constant 4 : index
    %c0_129 = arith.constant 0 : index
    %c0_130 = arith.constant 0 : index
    %123 = vector.load %arg3[%c4_128, %c0_129, %c0_130] : memref<9x8x8xbf16, #tpu.memory_space<vmem>>, vector<1x8x8xbf16>
    %124 = vector.shape_cast %123 : vector<1x8x8xbf16> to vector<8x8xbf16>
    %125 = vector.shape_cast %122 : vector<8x8x8xbf16> to vector<64x8xbf16>
    %cst_131 = arith.constant dense<0.000000e+00> : vector<8x64xf32>
    %126 = tpu.matmul %124, %125, %cst_131 {dimension_numbers = #tpu.dot_dimension_numbers<[1], [1], [0], [0], [0, 0, 1, 0], [], []>} : vector<8x8xbf16>, vector<64x8xbf16>, vector<8x64xf32> -> vector<8x64xf32>
    %127 = arith.addf %121, %126 : vector<8x64xf32>
    %c1_132 = arith.constant 1 : index
    %c9_133 = arith.constant 9 : index
    %c0_134 = arith.constant 0 : index
    %128 = vector.load %arg8[%c1_132, %c9_133, %c0_134] : memref<10x24x8xbf16, #tpu.memory_space<vmem>>, vector<8x8x8xbf16>
    %c5_135 = arith.constant 5 : index
    %c0_136 = arith.constant 0 : index
    %c0_137 = arith.constant 0 : index
    %129 = vector.load %arg3[%c5_135, %c0_136, %c0_137] : memref<9x8x8xbf16, #tpu.memory_space<vmem>>, vector<1x8x8xbf16>
    %130 = vector.shape_cast %129 : vector<1x8x8xbf16> to vector<8x8xbf16>
    %131 = vector.shape_cast %128 : vector<8x8x8xbf16> to vector<64x8xbf16>
    %cst_138 = arith.constant dense<0.000000e+00> : vector<8x64xf32>
    %132 = tpu.matmul %130, %131, %cst_138 {dimension_numbers = #tpu.dot_dimension_numbers<[1], [1], [0], [0], [0, 0, 1, 0], [], []>} : vector<8x8xbf16>, vector<64x8xbf16>, vector<8x64xf32> -> vector<8x64xf32>
    %133 = arith.addf %127, %132 : vector<8x64xf32>
    %c2_139 = arith.constant 2 : index
    %c7_140 = arith.constant 7 : index
    %c0_141 = arith.constant 0 : index
    %134 = vector.load %arg8[%c2_139, %c7_140, %c0_141] : memref<10x24x8xbf16, #tpu.memory_space<vmem>>, vector<8x8x8xbf16>
    %c6_142 = arith.constant 6 : index
    %c0_143 = arith.constant 0 : index
    %c0_144 = arith.constant 0 : index
    %135 = vector.load %arg3[%c6_142, %c0_143, %c0_144] : memref<9x8x8xbf16, #tpu.memory_space<vmem>>, vector<1x8x8xbf16>
    %136 = vector.shape_cast %135 : vector<1x8x8xbf16> to vector<8x8xbf16>
    %137 = vector.shape_cast %134 : vector<8x8x8xbf16> to vector<64x8xbf16>
    %cst_145 = arith.constant dense<0.000000e+00> : vector<8x64xf32>
    %138 = tpu.matmul %136, %137, %cst_145 {dimension_numbers = #tpu.dot_dimension_numbers<[1], [1], [0], [0], [0, 0, 1, 0], [], []>} : vector<8x8xbf16>, vector<64x8xbf16>, vector<8x64xf32> -> vector<8x64xf32>
    %139 = arith.addf %133, %138 : vector<8x64xf32>
    %c2_146 = arith.constant 2 : index
    %c8_147 = arith.constant 8 : index
    %c0_148 = arith.constant 0 : index
    %140 = vector.load %arg8[%c2_146, %c8_147, %c0_148] : memref<10x24x8xbf16, #tpu.memory_space<vmem>>, vector<8x8x8xbf16>
    %c7_149 = arith.constant 7 : index
    %c0_150 = arith.constant 0 : index
    %c0_151 = arith.constant 0 : index
    %141 = vector.load %arg3[%c7_149, %c0_150, %c0_151] : memref<9x8x8xbf16, #tpu.memory_space<vmem>>, vector<1x8x8xbf16>
    %142 = vector.shape_cast %141 : vector<1x8x8xbf16> to vector<8x8xbf16>
    %143 = vector.shape_cast %140 : vector<8x8x8xbf16> to vector<64x8xbf16>
    %cst_152 = arith.constant dense<0.000000e+00> : vector<8x64xf32>
    %144 = tpu.matmul %142, %143, %cst_152 {dimension_numbers = #tpu.dot_dimension_numbers<[1], [1], [0], [0], [0, 0, 1, 0], [], []>} : vector<8x8xbf16>, vector<64x8xbf16>, vector<8x64xf32> -> vector<8x64xf32>
    %145 = arith.addf %139, %144 : vector<8x64xf32>
    %c2_153 = arith.constant 2 : index
    %c9_154 = arith.constant 9 : index
    %c0_155 = arith.constant 0 : index
    %146 = vector.load %arg8[%c2_153, %c9_154, %c0_155] : memref<10x24x8xbf16, #tpu.memory_space<vmem>>, vector<8x8x8xbf16>
    %c8_156 = arith.constant 8 : index
    %c0_157 = arith.constant 0 : index
    %c0_158 = arith.constant 0 : index
    %147 = vector.load %arg3[%c8_156, %c0_157, %c0_158] : memref<9x8x8xbf16, #tpu.memory_space<vmem>>, vector<1x8x8xbf16>
    %148 = vector.shape_cast %147 : vector<1x8x8xbf16> to vector<8x8xbf16>
    %149 = vector.shape_cast %146 : vector<8x8x8xbf16> to vector<64x8xbf16>
    %cst_159 = arith.constant dense<0.000000e+00> : vector<8x64xf32>
    %150 = tpu.matmul %148, %149, %cst_159 {dimension_numbers = #tpu.dot_dimension_numbers<[1], [1], [0], [0], [0, 0, 1, 0], [], []>} : vector<8x8xbf16>, vector<64x8xbf16>, vector<8x64xf32> -> vector<8x64xf32>
    %151 = arith.addf %145, %150 : vector<8x64xf32>
    %c0_160 = arith.constant 0 : index
    %c0_161 = arith.constant 0 : index
    %152 = vector.load %arg5[%c0_160, %c0_161] : memref<8x1xf32, #tpu.memory_space<vmem>>, vector<8x1xf32>
    %153 = vector.broadcast %152 : vector<8x1xf32> to vector<8x64xf32>
    %154 = arith.addf %151, %153 : vector<8x64xf32>
    %cst_162 = arith.constant 0.000000e+00 : f32
    %155 = vector.broadcast %cst_162 : f32 to vector<8x64xf32>
    %156 = arith.maximumf %154, %155 : vector<8x64xf32>
    %c0_163 = arith.constant 0 : index
    %c0_164 = arith.constant 0 : index
    %c0_165 = arith.constant 0 : index
    %157 = vector.load %arg6[%c0_163, %c0_164, %c0_165] : memref<1x8x64xf32, #tpu.memory_space<vmem>>, vector<1x8x64xf32>
    %158 = vector.shape_cast %157 : vector<1x8x64xf32> to vector<8x64xf32>
    %159 = vector.shape_cast %156 : vector<8x64xf32> to vector<1x8x64xf32>
    tpu.vector_store %arg6[%c0_163, %c0_164, %c0_165], %159 {strides = array<i32>} : memref<1x8x64xf32, #tpu.memory_space<vmem>>, vector<1x8x64xf32>,
    return
  }
  func.func @transform_0(%arg0: i32) -> (i32, i32, i32, i32, i32) {
    %c0_i32 = arith.constant 0 : i32
    %c0_i32_0 = arith.constant 0 : i32
    %c0_i32_1 = arith.constant 0 : i32
    %c0_i32_2 = arith.constant 0 : i32
    %c0_i32_3 = arith.constant 0 : i32
    return %arg0, %c0_i32, %c0_i32_0, %c0_i32_1, %c0_i32_2 : i32, i32, i32, i32, i32
  }
  func.func @transform_1(%arg0: i32) -> (i32, i32, i32) {
    %c0_i32 = arith.constant 0 : i32
    %c0_i32_0 = arith.constant 0 : i32
    %c0_i32_1 = arith.constant 0 : i32
    %c0_i32_2 = arith.constant 0 : i32
    return %c0_i32, %c0_i32_0, %c0_i32_1 : i32, i32, i32
  }
  func.func @transform_2(%arg0: i32) -> (i32, i32, i32) {
    %c0_i32 = arith.constant 0 : i32
    %c0_i32_0 = arith.constant 0 : i32
    %c0_i32_1 = arith.constant 0 : i32
    %c0_i32_2 = arith.constant 0 : i32
    return %c0_i32, %c0_i32_0, %c0_i32_1 : i32, i32, i32
  }
  func.func @transform_3(%arg0: i32) -> (i32, i32) {
    %c0_i32 = arith.constant 0 : i32
    %c0_i32_0 = arith.constant 0 : i32
    %c0_i32_1 = arith.constant 0 : i32
    return %c0_i32, %c0_i32_0 : i32, i32
  }
  func.func @transform_4(%arg0: i32) -> (i32, i32) {
    %c0_i32 = arith.constant 0 : i32
    %c0_i32_0 = arith.constant 0 : i32
    %c0_i32_1 = arith.constant 0 : i32
    return %c0_i32, %c0_i32_0 : i32, i32
  }
  func.func @transform_5(%arg0: i32) -> (i32, i32, i32) {
    %c0_i32 = arith.constant 0 : i32
    %c0_i32_0 = arith.constant 0 : i32
    %c0_i32_1 = arith.constant 0 : i32
    return %arg0, %c0_i32, %c0_i32_0 : i32, i32, i32
  }
}

</mosaic_0001>

<bundles_post_ra>
// kernel: down_forward.1
= control target key start
LH: loop header
LB: loop body
LE: loop exit
PB: predicated region body
PF: predicated region fallthrough
CT: control target
= control target key end

     0   :  { %s4188_s18 = smov 0   ;;  %s5142_s0 = inlined_call_operand.vmem [shape: f32[2,8,2,8,8], index: 0, kind: input, shape index: {}]   ;;  %s5143_s1 = inlined_call_operand.vmem [shape: bf16[9,4,8], index: 1, kind: input, shape index: {}]   ;;  %s5144_s2 = inlined_call_operand.vmem [shape: bf16[9,8,8], index: 2, kind: input, shape index: {}]   ;;  %s5145_s3 = inlined_call_operand.vmem [shape: f32[1,8], index: 3, kind: input, shape index: {}]   ;;  %s5146_s4 = inlined_call_operand.vmem [shape: f32[8,1], index: 4, kind: input, shape index: {}]   ;;  %s5147_s5 = inlined_call_operand.vmem [shape: f32[2,8,64], index: 5, kind: output, shape index: {}]  }
   0x1 LB: > { %s3539_s19 = sadd.s32 4294967295, %s4152_s18   ;;  %p3543_p0 = scmp.ge.s32.totalorder %s4152_s18, 1  ;;  %s4152_s18 = sphi %s4188_s18, %s15_s18  }
   0x2   : > { %p187_p1 = scmp.lt.s32.totalorder %s4152_s18, 3 }
   0x4   : > { %p188_p2 = pnand %p3543_p0, %p187_p1 }
   0x5   : > { %p214_p3 = scmp.lt.s32.totalorder (!%p188_p2), %s3539_s19, 1  ;;  %vm224_vm0 = vcmask (!%p188_p2), 27648   ;;  %v4154_v3 = vmov (!%p188_p2), 0   ;;  %s4155_s24 = smov (!%p188_p2), 124   ;;  %v3555_v24 = vld [vmem:[%s5143_s1 + $0x2] sm:$0x3] (!%p188_p2) }
   0x6   : > { %191 = sbr.rel (%p188_p2) target bundleno = 957 (0x3bd), region = 40  ;;  %226 = vst.msk [vmem:[#allocation2 + $0x4] sm:$0xf] (!%p188_p2), %vm224_vm0, %v4154_v3  ;;  %225 = vst.msk [vmem:[#allocation2] sm:$0xf] (!%p188_p2), %vm224_vm0, %v4154_v3  ;;  %4120 = vset.pattern.permute.xlu1 (!%p188_p2), %v4154_v3  ;;  %4121 = vset.pattern.permute.xlu0 (!%p188_p2), %v4154_v3  ;;  %vm520_vm1 = vcmask (!%p188_p2), 1041408  }
   0x7   : > { %227 = vst.msk [vmem:[#allocation2 + $0x8] sm:$0xf] (!%p188_p2), %vm224_vm0, %v4154_v3  ;;  %229 = vst.msk [vmem:[#allocation2 + $0x6c] sm:$0xf] (!%p188_p2), %vm224_vm0, %v4154_v3  ;;  %4084 = vmatprep.subr.msk.bf16.mxu0 (!%p188_p2), %vm520_vm1, %v3555_v24  ;;  %v522_v26 = vsel (!%p188_p2), %vm520_vm1, %v3555_v24, 0  ;;  %vm507_vm2 = vcmask (!%p188_p2), 31744  }
   0x8   : > { %230 = vst.msk [vmem:[#allocation2 + $0x70] sm:$0xf] (!%p188_p2), %vm224_vm0, %v4154_v3  ;;  %231 = vst.msk [vmem:[#allocation2 + $0x74] sm:$0xf] (!%p188_p2), %vm224_vm0, %v4154_v3  ;;  %3823 = vmatpush3.bf16.msra.mxu0 (!%p188_p2), %v522_v26  ;;  %v4282_v30 = vld [vmem:[%s5143_s1] sm:$0x3] (!%p188_p2) }
   0x9   : > { %233 = vst.msk [vmem:[#allocation2 + $0xc] sm:$0xf] (!%p188_p2), %vm224_vm0, %v4154_v3  ;;  %234 = vst.msk [vmem:[#allocation2 + $0x18] sm:$0xf] (!%p188_p2), %vm224_vm0, %v4154_v3  ;;  %4085 = vmatprep.subr.msk.bf16.mxu0 (!%p188_p2), %vm520_vm1, %v4282_v30  ;;  %vm377_vm3 = vsmask.f32 (!%p188_p2), 256 }
   0xa   : > { %235 = vst.msk [vmem:[#allocation2 + $0x24] sm:$0xf] (!%p188_p2), %vm224_vm0, %v4154_v3  ;;  %236 = vst.msk [vmem:[#allocation2 + $0x30] sm:$0xf] (!%p188_p2), %vm224_vm0, %v4154_v3  ;;  %vm378_vm4 = vsmask.f32 (!%p188_p2), 4368 }
   0xb   : > { %237 = vst.msk [vmem:[#allocation2 + $0x3c] sm:$0xf] (!%p188_p2), %vm224_vm0, %v4154_v3  ;;  %238 = vst.msk [vmem:[#allocation2 + $0x48] sm:$0xf] (!%p188_p2), %vm224_vm0, %v4154_v3  ;;  %vm697_vm6 = vsmask.f32 (!%p188_p2), 3328 }
   0xc   : > { %239 = vst.msk [vmem:[#allocation2 + $0x54] sm:$0xf] (!%p188_p2), %vm224_vm0, %v4154_v3  ;;  %240 = vst.msk [vmem:[#allocation2 + $0x60] sm:$0xf] (!%p188_p2), %vm224_vm0, %v4154_v3  ;;  %vm698_vm7 = vsmask.f32 (!%p188_p2), 7440 }
   0xd   : > { %s5153_s19 = smov (!%p214_p3, %s3539_s19), 1  ;;  %243 = vst.msk [vmem:[#allocation2 + $0x14] sm:$0xf] %vm224_vm0, %v4154_v3  ;;  %244 = vst.msk [vmem:[#allocation2 + $0x20] sm:$0xf] %vm224_vm0, %v4154_v3  ;;  %vm252_vm9 = vcmask 60416  }
   0xe   : > { %s3731_s20 = sshll.u32 %s5153_s19, 7  ;;  %245 = vst.msk [vmem:[#allocation2 + $0x2c] sm:$0xf] %vm224_vm0, %v4154_v3  ;;  %246 = vst.msk [vmem:[#allocation2 + $0x38] sm:$0xf] %vm224_vm0, %v4154_v3  ;;  %vm4157_vm10 = vmmov 0  }
   0xf   : > { %s4202_s23 = scalar_lea.vmem %s5142_s0, %s3731_s20  ;;  %247 = vst.msk [vmem:[#allocation2 + $0x44] sm:$0xf] %vm224_vm0, %v4154_v3  ;;  %248 = vst.msk [vmem:[#allocation2 + $0x50] sm:$0xf] %vm224_vm0, %v4154_v3  ;;  %v362_v42 = vld [vmem:[#allocation2 + $0x4] sm:$0xf] }
  0x10   : > { %v286_v0 = vld [vmem:[%s4202_s23 + $0x30] sm:$0xff]  ;;  %v287_v1 = vld [vmem:[%s4202_s23 + $0x38] sm:$0xff]  ;;  %v288_v2 = vld [vmem:[%s4202_s23 + $0x40] sm:$0xff]  ;;  %249 = vst.msk [vmem:[#allocation2 + $0x5c] sm:$0xf] %vm224_vm0, %v4154_v3  ;;  %v386_v54 = vshrl.u32 %v362_v42, 16 }
  0x11   : > { %250 = vst.msk [vmem:[#allocation2 + $0x68] sm:$0xf] %vm224_vm0, %v4154_v3  ;;  %v289_v4 = vld [vmem:[%s4202_s23 + $0x48] sm:$0xff]  ;;  %v299_v5 = vmax.f32 %v286_v0, %v287_v1  ;;  %v280_v6 = vld [vmem:[%s4202_s23] sm:$0xff]  ;;  %232 = vst.msk [vmem:[#allocation2] sm:$0xf] %vm224_vm0, %v4154_v3 }
  0x12   : > { %v281_v7 = vld [vmem:[%s4202_s23 + $0x8] sm:$0xff]  ;;  %241 = vst.msk [vmem:[#allocation2 + $0x6c] sm:$0xf] %vm224_vm0, %v4154_v3  ;;  %242 = vst.msk [vmem:[#allocation2 + $0x8] sm:$0xf] %vm224_vm0, %v4154_v3  ;;  %v300_v8 = vmax.f32 %v288_v2, %v289_v4  ;;  %v282_v9 = vld [vmem:[%s4202_s23 + $0x10] sm:$0xff] }
  0x13   : > { %251 = vst.msk [vmem:[#allocation2 + $0x74] sm:$0xf] %vm224_vm0, %v4154_v3  ;;  %v283_v10 = vld [vmem:[%s4202_s23 + $0x18] sm:$0xff]  ;;  %v296_v11 = vmax.f32 %v280_v6, %v281_v7  ;;  %v290_v12 = vld [vmem:[%s4202_s23 + $0x50] sm:$0xff]  ;;  %v292_v15 = vld [vmem:[%s4202_s23 + $0x60] sm:$0xff]  ;;  %v388_v0 = vrot.slane %v386_v54, 7 }
  0x14   : > { %v297_v13 = vmax.f32 %v282_v9, %v283_v10  ;;  %v291_v14 = vld [vmem:[%s4202_s23 + $0x58] sm:$0xff]  ;;  %v293_v16 = vld [vmem:[%s4202_s23 + $0x68] sm:$0xff]  ;;  %v4110_v17 = vpack.i.bf16 %v300_v8, %v299_v5  ;;  %v284_v20 = vld [vmem:[%s4202_s23 + $0x20] sm:$0xff]  ;;  %v389_v1 = vshll.u32 %v362_v42, 16  ;;  %253 = vst.msk [vmem:[#allocation3] sm:$0xf] %vm252_vm9, %v4154_v3 }
  0x15   : > { %v301_v18 = vmax.f32 %v290_v12, %v291_v14  ;;  %v302_v19 = vmax.f32 %v292_v15, %v293_v16  ;;  %v285_v21 = vld [vmem:[%s4202_s23 + $0x28] sm:$0xff]  ;;  %v294_v27 = vld [vmem:[%s4202_s23 + $0x70] sm:$0xff]  ;;  %v295_v28 = vld [vmem:[%s4202_s23 + $0x78] sm:$0xff]  ;;  %254 = vst.msk [vmem:[#allocation3 + $0x4] sm:$0xf] %vm252_vm9, %v4154_v3  ;;  %vm2222_vm11 = vcmask 64512  }
  0x16   : > { %v4105_v22 = vpack.i.bf16 %v297_v13, %v296_v11  ;;  %4111 = vrot.lane.b32.xlu1 %v4110_v17, %s4155_s24  ;;  %v298_v25 = vmax.f32 %v284_v20, %v285_v21  ;;  %v303_v29 = vmax.f32 %v294_v27, %v295_v28  ;;  %v681_v51 = vld [vmem:[#allocation2 + $0x4] sm:$0xf]  ;;  %v363_v60 = vld [vmem:[#allocation2 + $0xc] sm:$0x8]  ;;  %v365_v6 = vld [vmem:[#allocation2 + $0x18] sm:$0x8] }
  0x17   : > { %v4115_v23 = vpack.i.bf16 %v302_v19, %v301_v18  ;;  %v701_v61 = vshrl.u32 %v681_v51, 16  ;;  %v704_v62 = vshll.u32 %v681_v51, 16  ;;  %v367_v7 = vld [vmem:[#allocation2 + $0x24] sm:$0x8]  ;;  %v369_v10 = vld [vmem:[#allocation2 + $0x30] sm:$0x8]  ;;  %vm4306_vm5 = vmor %vm377_vm3, %vm378_vm4 }
  0x18   : > { %4106 = vrot.lane.b32.xlu0 %v4105_v22, %s4155_s24  ;;  %v361_v56 = vld [vmem:[#allocation2] sm:$0x8]  ;;  %v407_v15 = vshrl.u32 %v365_v6, 16  ;;  %v420_v21 = vshrl.u32 %v367_v7, 16  ;;  %vm4372_vm8 = vmor %vm697_vm6, %vm698_vm7  ;;  %255 = vst.msk [vmem:[#allocation3 + $0x8] sm:$0xf] %vm252_vm9, %v4154_v3 }
  0x19   : > { %v381_v2 = vshrl.u32 %v361_v56, 16  ;;  %v706_v9 = vrot.slane %v704_v62, 5  ;;  %v682_v16 = vld [vmem:[#allocation2 + $0x8] sm:$0x1]  ;;  %257 = vst.msk [vmem:[#allocation3 + $0x6c] sm:$0xf] %vm252_vm9, %v4154_v3 }
  0x1a   : > { %4116 = vrot.lane.b32.xlu1 %v4115_v23, %s4155_s24  ;;  %258 = vst.msk [vmem:[#allocation3 + $0x70] sm:$0xf] %vm252_vm9, %v4154_v3  ;;  %259 = vst.msk [vmem:[#allocation3 + $0x74] sm:$0xf] %vm252_vm9, %v4154_v3  ;;  %v3476_v24 = vld [vmem:[%s5146_s4] sm:$0xff]  ;;  %s3546_s17 = sshll.u32 %s5153_s19, 3 }
  0x1b   : > { %v4296_v14 = vrot.slane %v381_v2, 11  ;;  %261 = vst.msk [vmem:[#allocation3 + $0xc] sm:$0xf] %vm252_vm9, %v4154_v3  ;;  %262 = vst.msk [vmem:[#allocation3 + $0x18] sm:$0xf] %vm252_vm9, %v4154_v3  ;;  %s222_s22 = scalar_lea.vmem %s5147_s5, %s3546_s17  ;;  %vm3484_vm12 = vcmask 523264  }
  0x1c   : > { %316 = vrot.lane.b32.xlu0 %v298_v25, %s4155_s24  ;;  %263 = vst.msk [vmem:[#allocation3 + $0x24] sm:$0xf] %vm252_vm9, %v4154_v3  ;;  %264 = vst.msk [vmem:[#allocation3 + $0x30] sm:$0xf] %vm252_vm9, %v4154_v3 }
  0x1d   : > { %265 = vst.msk [vmem:[#allocation3 + $0x3c] sm:$0xf] %vm252_vm9, %v4154_v3  ;;  %266 = vst.msk [vmem:[#allocation3 + $0x48] sm:$0xf] %vm252_vm9, %v4154_v3 }
  0x1e   : > { %267 = vst.msk [vmem:[#allocation3 + $0x54] sm:$0xf] %vm252_vm9, %v4154_v3  ;;  %268 = vst.msk [vmem:[#allocation3 + $0x60] sm:$0xf] %vm252_vm9, %v4154_v3  ;;  %3479 = vperm.xlu1 %4120, %v3476_v24  }
  0x1f   : > { %271 = vst.msk [vmem:[#allocation3 + $0x14] sm:$0xf] %vm252_vm9, %v4154_v3  ;;  %272 = vst.msk [vmem:[#allocation3 + $0x20] sm:$0xf] %vm252_vm9, %v4154_v3 }
  0x20   : > { %326 = vrot.lane.b32.xlu0 %v303_v29, %s4155_s24  ;;  %273 = vst.msk [vmem:[#allocation3 + $0x2c] sm:$0xf] %vm252_vm9, %v4154_v3  ;;  %274 = vst.msk [vmem:[#allocation3 + $0x38] sm:$0xf] %vm252_vm9, %v4154_v3 }
  0x21   : > { %275 = vst.msk [vmem:[#allocation3 + $0x44] sm:$0xf] %vm252_vm9, %v4154_v3  ;;  %276 = vst.msk [vmem:[#allocation3 + $0x50] sm:$0xf] %vm252_vm9, %v4154_v3 }
  0x22   : > { %277 = vst.msk [vmem:[#allocation3 + $0x5c] sm:$0xf] %vm252_vm9, %v4154_v3  ;;  %278 = vst.msk [vmem:[#allocation3 + $0x68] sm:$0xf] %vm252_vm9, %v4154_v3 }
  0x23   : > { %260 = vst.msk [vmem:[#allocation3] sm:$0xf] %vm252_vm9, %v4154_v3  ;;  %269 = vst.msk [vmem:[#allocation3 + $0x6c] sm:$0xf] %vm252_vm9, %v4154_v3 }
  0x24   : > { %270 = vst.msk [vmem:[#allocation3 + $0x8] sm:$0xf] %vm252_vm9, %v4154_v3  ;;  %279 = vst.msk [vmem:[#allocation3 + $0x74] sm:$0xf] %vm252_vm9, %v4154_v3 }
  0x88   : > { %v4112_v31 = vpop.permute.xlu1 %4111 }
  0x89   : > { %v4114_v32 = vunpack.i.h.bf16 %v4112_v31  ;;  %v4113_v33 = vunpack.i.l.bf16 %v4112_v31  ;;  %v373_v31 = vld [vmem:[#allocation2 + $0x48] sm:$0x8] }
  0x8a   : > { %v4107_v34 = vpop.permute.xlu0 %4106 }
  0x8b   : > { %v4109_v35 = vunpack.i.h.bf16 %v4107_v34  ;;  %v4108_v36 = vunpack.i.l.bf16 %v4107_v34  ;;  %v340_v37 = vmax.f32 %v300_v8, %v4114_v32  ;;  %v339_v38 = vmax.f32 %v299_v5, %v4113_v33 }
  0x8c   : > { %v4117_v41 = vpop.permute.xlu1 %4116  ;;  %v394_v5 = vshrl.u32 %v363_v60, 16  ;;  %v703_v8 = vrot.slane %v701_v61, 4  ;;  %v710_v32 = vshll.u32 %v682_v16, 16 }
  0x8d   : > { %v337_v39 = vmax.f32 %v297_v13, %v4109_v35  ;;  %v336_v40 = vmax.f32 %v296_v11, %v4108_v36  ;;  %v348_v43 = vpack.c.bf16 %v340_v37, %v340_v37  ;;  %v347_v44 = vpack.c.bf16 %v339_v38, %v339_v38  ;;  %v371_v11 = vld [vmem:[#allocation2 + $0x3c] sm:$0x8]  ;;  %v375_v37 = vld [vmem:[#allocation2 + $0x54] sm:$0x8] }
  0x8e   : > { %v4119_v45 = vunpack.i.h.bf16 %v4117_v41  ;;  %v4118_v46 = vunpack.i.l.bf16 %v4117_v41  ;;  %v317_v47 = vpop.permute.xlu0 %316  ;;  %v4294_v13 = vor.u32 %v389_v1, %v388_v0  ;;  %v446_v26 = vshrl.u32 %v371_v11, 16  ;;  %v3572_v41 = vld [vmem:[%s5143_s1 + $0x4] sm:$0x3] }
  0x8f   : > { %v345_v48 = vpack.c.bf16 %v337_v39, %v337_v39  ;;  %v344_v49 = vpack.c.bf16 %v336_v40, %v336_v40  ;;  %v338_v50 = vmax.f32 %v298_v25, %v317_v47  ;;  %357 = vst.msk [vmem:[#allocation2 + $0x40] sm:$0xf] %vm224_vm0, %v348_v43  ;;  %356 = vst.msk [vmem:[#allocation2 + $0x34] sm:$0xf] %vm224_vm0, %v347_v44  ;;  %v433_v25 = vshrl.u32 %v369_v10, 16 }
  0x90   : > { %v342_v52 = vmax.f32 %v302_v19, %v4119_v45  ;;  %v341_v53 = vmax.f32 %v301_v18, %v4118_v46  ;;  %v614_v19 = vsel %vm520_vm1, %v4282_v30, 0  ;;  %v707_v27 = vor.u32 %v706_v9, %v703_v8  ;;  %v4351_v9 = vld [vmem:[#allocation2 + $0x2c] sm:$0x1] }
  0x91   : > { %354 = vst.msk [vmem:[#allocation2 + $0x1c] sm:$0xf] %vm224_vm0, %v345_v48  ;;  %353 = vst.msk [vmem:[#allocation2 + $0x10] sm:$0xf] %vm224_vm0, %v344_v49  ;;  %v346_v55 = vpack.c.bf16 %v338_v50, %v338_v50  ;;  %v392_v39 = vsel %vm4306_vm5, %v4296_v14, %v4294_v13  ;;  %v3548_v40 = vrot.slane %v394_v5, 11  ;;  %v4328_v44 = vrot.slane %v420_v21, 11 }
  0x92   : > { %v350_v57 = vpack.c.bf16 %v342_v52, %v342_v52  ;;  %v349_v58 = vpack.c.bf16 %v341_v53, %v341_v53  ;;  %v327_v59 = vpop.permute.xlu0 %326  ;;  %v4330_v45 = vrot.slane %v433_v25, 11  ;;  %v4332_v47 = vrot.slane %v707_v27, 4  ;;  %v684_v52 = vld [vmem:[#allocation2 + $0x14] sm:$0x1] }
  0x93   : > { %355 = vst.msk [vmem:[#allocation2 + $0x28] sm:$0xf] %vm224_vm0, %v346_v55  ;;  %v343_v63 = vmax.f32 %v303_v29, %v327_v59  ;;  %v4336_v49 = vrot.slane %v446_v26, 11  ;;  %v459_v50 = vshrl.u32 %v373_v31, 16  ;;  %v472_v51 = vshrl.u32 %v375_v37, 16 }
  0x94   : > { %359 = vst.msk [vmem:[#allocation2 + $0x58] sm:$0xf] %vm224_vm0, %v350_v57  ;;  %358 = vst.msk [vmem:[#allocation2 + $0x4c] sm:$0xf] %vm224_vm0, %v349_v58  ;;  %v4340_v57 = vrot.slane %v710_v32, 5  ;;  %v724_v2 = vshll.u32 %v684_v52, 16 }
  0x95   : > { %v351_v4 = vpack.c.bf16 %v343_v63, %v343_v63  ;;  %v4347_v7 = vrot.slane %v459_v50, 11  ;;  %v4349_v8 = vrot.slane %v472_v51, 11  ;;  %v752_v21 = vshll.u32 %v4351_v9, 16  ;;  %v686_v52 = vld [vmem:[#allocation2 + $0x20] sm:$0x1] }
  0x96   : > { %v4300_v20 = vld [vmem:[#allocation2 + $0x34] sm:$0xf]  ;;  %v4302_v23 = vld [vmem:[#allocation2 + $0x40] sm:$0xf] }
  0x97   : > { %360 = vst.msk [vmem:[#allocation2 + $0x64] sm:$0xf] %vm224_vm0, %v351_v4  ;;  %v3558_v30 = vcombine.low %v4300_v20, %v4302_v23  ;;  %v438_v36 = vshrl.u32 %v4300_v20, 16  ;;  %v451_v38 = vshrl.u32 %v4302_v23, 16  ;;  %v441_v55 = vshll.u32 %v4300_v20, 16 }
  0x98   : > { %v364_v12 = vld [vmem:[#allocation2 + $0x10] sm:$0xf]  ;;  %v4311_v29 = vld [vmem:[#allocation2 + $0x1c] sm:$0xf]  ;;  %v454_v59 = vshll.u32 %v4302_v23, 16  ;;  %v4356_v20 = vrot.slane %v724_v2, 5 }
  0x99   : > { %v399_v17 = vshrl.u32 %v364_v12, 16  ;;  %v3556_v18 = vcombine.low %v362_v42, %v364_v12  ;;  %v402_v33 = vshll.u32 %v364_v12, 16  ;;  %v4325_v42 = vrot.slane %v407_v15, 11  ;;  %v683_v46 = vld [vmem:[#allocation2 + $0x10] sm:$0xf] }
  0x9a   : > { %v368_v22 = vld [vmem:[#allocation2 + $0x28] sm:$0xf]  ;;  %v412_v48 = vshrl.u32 %v4311_v29, 16  ;;  %v440_v54 = vrot.slane %v438_v36, 7  ;;  %v453_v58 = vrot.slane %v451_v38, 7  ;;  %v715_v61 = vshrl.u32 %v683_v46, 16 }
  0x9b   : > { %v401_v28 = vrot.slane %v399_v17, 7  ;;  %3824 = vmatprep.mubr.msk.bf16.mxu0 %vm507_vm2, %v3556_v18  ;;  %v425_v34 = vshrl.u32 %v368_v22, 16  ;;  %v3557_v35 = vcombine.low %v4311_v29, %v368_v22  ;;  %v374_v56 = vld [vmem:[#allocation2 + $0x4c] sm:$0xf]  ;;  %v376_v60 = vld [vmem:[#allocation2 + $0x58] sm:$0xf] }
  0x9c   : > { %v718_v62 = vshll.u32 %v683_v46, 16  ;;  %v428_v63 = vshll.u32 %v368_v22, 16  ;;  %v3559_v0 = vcombine.low %v374_v56, %v376_v60  ;;  %v4345_v4 = vld [vmem:[#allocation2 + $0xc] sm:$0x8]  ;;  %v414_v5 = vrot.slane %v412_v48, 7 }
  0x9d   : > { %v404_v43 = vor.u32 %v402_v33, %v401_v28  ;;  %3825 = vmatmul.mubr.msk.bf16.vlgmr.msra.gmra.mrb[0].mxu0 %vm507_vm2, %v3557_v35  ;;  %v427_v53 = vrot.slane %v425_v34, 7  ;;  %v464_v6 = vshrl.u32 %v374_v56, 16  ;;  %v415_v10 = vshll.u32 %v4311_v29, 16  ;;  %v687_v18 = vld [vmem:[#allocation2 + $0x28] sm:$0xf] }
  0x9e   : > { %3833 = vmatpush3.bf16.msra.mxu0 %v614_v19  ;;  %3828 = vmatprep.mubr.msk.bf16.mxu0 %vm507_vm2, %v3558_v30  ;;  %v477_v12 = vshrl.u32 %v376_v60, 16  ;;  %v443_v13 = vor.u32 %v441_v55, %v440_v54  ;;  %v456_v15 = vor.u32 %v454_v59, %v453_v58  ;;  %v717_v16 = vrot.slane %v715_v61, 4  ;;  %v689_v27 = vld [vmem:[#allocation2 + $0x34] sm:$0xf]  ;;  %v691_v28 = vld [vmem:[#allocation2 + $0x40] sm:$0xf] }
  0x9f   : > { %4086 = vmatprep.subr.msk.bf16.mxu0 %vm520_vm1, %v3572_v41  ;;  %v405_v1 = vsel %vm4306_vm5, %v3548_v40, %v404_v43  ;;  %v430_v11 = vor.u32 %v428_v63, %v427_v53  ;;  %v720_v17 = vrot.slane %v718_v62, 5  ;;  %v839_v19 = vsel %vm520_vm1, %v3572_v41, 0  ;;  %v685_v31 = vld [vmem:[#allocation2 + $0x1c] sm:$0xf]  ;;  %v692_v55 = vld [vmem:[#allocation2 + $0x44] sm:$0x1] }
  0xa0   : > { %v3564_v14 = vcombine.low %v392_v39, %v405_v1  ;;  %v931_v22 = vshrl.u32 %v4345_v4, 16  ;;  %v417_v23 = vor.u32 %v415_v10, %v414_v5  ;;  %v466_v25 = vrot.slane %v464_v6, 7  ;;  %v690_v39 = vld [vmem:[#allocation2 + $0x38] sm:$0x1]  ;;  %v693_v61 = vld [vmem:[#allocation2 + $0x4c] sm:$0xf] }
  0xa1   : > { %v467_v26 = vshll.u32 %v374_v56, 16  ;;  %v479_v29 = vrot.slane %v477_v12, 7  ;;  %v480_v30 = vshll.u32 %v376_v60, 16  ;;  %v743_v32 = vshrl.u32 %v687_v18, 16  ;;  %v695_v2 = vld [vmem:[#allocation2 + $0x58] sm:$0xf] }
  0xa2   : > { %v746_v33 = vshll.u32 %v687_v18, 16  ;;  %v431_v34 = vsel %vm4306_vm5, %v4328_v44, %v430_v11  ;;  %v444_v35 = vsel %vm4306_vm5, %v4330_v45, %v443_v13  ;;  %v457_v36 = vsel %vm4306_vm5, %v4336_v49, %v456_v15  ;;  %v694_v12 = vld [vmem:[#allocation2 + $0x50] sm:$0x1] }
  0xa3   : > { %v721_v37 = vor.u32 %v720_v17, %v717_v16  ;;  %v757_v40 = vshrl.u32 %v689_v27, 16  ;;  %v760_v41 = vshll.u32 %v689_v27, 16  ;;  %v771_v43 = vshrl.u32 %v691_v28, 16  ;;  %v696_v27 = vld [vmem:[#allocation2 + $0x5c] sm:$0x1] }
  0xa4   : > { %v774_v44 = vshll.u32 %v691_v28, 16  ;;  %v418_v45 = vsel %vm4306_vm5, %v4325_v42, %v417_v23  ;;  %v469_v46 = vor.u32 %v467_v26, %v466_v25  ;;  %v729_v48 = vshrl.u32 %v685_v31, 16  ;;  %v4386_v42 = vld [vmem:[%s5143_s1 + $0x6] sm:$0x3]  ;;  %v4401_v25 = vld [vmem:[#allocation2 + $0x10] sm:$0xf] }
  0xa5   : > { %3829 = vmatmul.mubr.msk.bf16.gmra.mrb[4].mxu0 %vm507_vm2, %v3559_v0  ;;  %v732_v50 = vshll.u32 %v685_v31, 16  ;;  %v3565_v49 = vcombine.low %v418_v45, %v431_v34  ;;  %v482_v51 = vor.u32 %v480_v30, %v479_v29  ;;  %v745_v53 = vrot.slane %v743_v32, 4  ;;  %v4403_v29 = vld [vmem:[#allocation2 + $0x1c] sm:$0xf] }
  0xa6   : > { %3834 = vmatprep.mubr.msk.bf16.mxu0 %vm507_vm2, %v3564_v14  ;;  %v748_v54 = vrot.slane %v746_v33, 5  ;;  %v3566_v56 = vcombine.low %v444_v35, %v457_v36  ;;  %v713_v58 = vsel %vm4372_vm8, %v4332_v47, %v4340_v57  ;;  %v722_v59 = vrot.slane %v721_v37, 4  ;;  %v916_v36 = vld [vmem:[#allocation2 + $0x18] sm:$0x8] }
  0xa7   : > { %v766_v60 = vshll.u32 %v690_v39, 16  ;;  %v759_v62 = vrot.slane %v757_v40, 4  ;;  %v762_v63 = vrot.slane %v760_v41, 5  ;;  %v773_v0 = vrot.slane %v771_v43, 4 }
  0xa8   : > { %v776_v1 = vrot.slane %v774_v44, 5  ;;  %v731_v5 = vrot.slane %v729_v48, 4  ;;  %v734_v47 = vrot.slane %v732_v50, 5  ;;  %v738_v57 = vshll.u32 %v686_v52, 16 }
  0xa9   : > { %v780_v6 = vshll.u32 %v692_v55, 16  ;;  %v470_v9 = vsel %vm4306_vm5, %v4347_v7, %v469_v46  ;;  %v483_v10 = vsel %vm4306_vm5, %v4349_v8, %v482_v51  ;;  %v749_v11 = vor.u32 %v748_v54, %v745_v53  ;;  %v4413_v53 = vld [vmem:[#allocation2 + $0x28] sm:$0xf]  ;;  %v4415_v54 = vld [vmem:[#allocation2 + $0x34] sm:$0xf] }
  0xaa   : > { %v785_v13 = vshrl.u32 %v693_v61, 16  ;;  %v727_v14 = vsel %vm4372_vm8, %v722_v59, %v4356_v20  ;;  %v788_v15 = vshll.u32 %v693_v61, 16  ;;  %v799_v16 = vshrl.u32 %v695_v2, 16  ;;  %v920_v59 = vld [vmem:[#allocation2 + $0x30] sm:$0x8] }
  0xab   : > { %v802_v17 = vshll.u32 %v695_v2, 16  ;;  %v754_v18 = vrot.slane %v752_v21, 5  ;;  %v768_v7 = vrot.slane %v766_v60, 5  ;;  %v777_v23 = vor.u32 %v776_v1, %v773_v0  ;;  %v922_v60 = vld [vmem:[#allocation2 + $0x3c] sm:$0x8] }
  0xac   : > { %v735_v8 = vor.u32 %v734_v47, %v731_v5  ;;  %v782_v26 = vrot.slane %v780_v6, 5  ;;  %v794_v28 = vshll.u32 %v694_v12, 16  ;;  %v3567_v30 = vcombine.low %v470_v9, %v483_v10  ;;  %v4426_v0 = vld [vmem:[#allocation2 + $0x40] sm:$0xf]  ;;  %v4428_v1 = vld [vmem:[#allocation2 + $0x4c] sm:$0xf] }
  0xad   : > { %3835 = vmatmul.mubr.msk.bf16.vlgmr.msra.gmra.mrb[0].mxu0 %vm507_vm2, %v3565_v49  ;;  %v3573_v31 = vcombine.low %v713_v58, %v727_v14  ;;  %v750_v32 = vrot.slane %v749_v11, 4  ;;  %v787_v33 = vrot.slane %v785_v13, 4  ;;  %v790_v20 = vrot.slane %v788_v15, 5  ;;  %v924_v6 = vld [vmem:[#allocation2 + $0x48] sm:$0x8] }
  0xae   : > { %3843 = vmatpush3.bf16.msra.mxu0 %v839_v19  ;;  %3838 = vmatprep.mubr.msk.bf16.mxu0 %vm507_vm2, %v3566_v56  ;;  %v763_v19 = vor.u32 %v762_v63, %v759_v62  ;;  %v801_v34 = vrot.slane %v799_v16, 4  ;;  %v804_v35 = vrot.slane %v802_v17, 5  ;;  %v936_v21 = vshrl.u32 %v4401_v25, 16 }
  0xaf   : > { %4087 = vmatprep.subr.msk.bf16.mxu0 %vm520_vm1, %v4386_v42  ;;  %v778_v39 = vrot.slane %v777_v23, 4  ;;  %v808_v40 = vshll.u32 %v696_v27, 16  ;;  %v949_v41 = vshrl.u32 %v4403_v29, 16  ;;  %v736_v43 = vrot.slane %v735_v8, 4 }
  0xb0   : > { %v764_v37 = vrot.slane %v763_v19, 4  ;;  %v740_v44 = vrot.slane %v738_v57, 5  ;;  %v796_v45 = vrot.slane %v794_v28, 5  ;;  %v3581_v46 = vrot.slane %v931_v22, 11  ;;  %v918_v22 = vld [vmem:[#allocation2 + $0x24] sm:$0x8] }
  0xb1   : > { %v944_v48 = vshrl.u32 %v916_v36, 16  ;;  %v755_v50 = vsel %vm4372_vm8, %v750_v32, %v754_v18  ;;  %v791_v49 = vor.u32 %v790_v20, %v787_v33  ;;  %v805_v51 = vor.u32 %v804_v35, %v801_v34  ;;  %v4450_v33 = vld [vmem:[#allocation2 + $0x58] sm:$0xf] }
  0xb2   : > { %v938_v52 = vrot.slane %v936_v21, 7  ;;  %v769_v55 = vsel %vm4372_vm8, %v764_v37, %v768_v7  ;;  %v783_v56 = vsel %vm4372_vm8, %v778_v39, %v782_v26  ;;  %v810_v58 = vrot.slane %v808_v40, 5  ;;  %v4455_v21 = vld [vmem:[#allocation2 + $0x64] sm:$0xf] }
  0xb3   : > { %v951_v4 = vrot.slane %v949_v41, 7  ;;  %v741_v61 = vsel %vm4372_vm8, %v736_v43, %v740_v44  ;;  %v1061_v62 = vsel %vm520_vm1, %v4386_v42, 0  ;;  %v939_v63 = vshll.u32 %v4401_v25, 16  ;;  %v3598_v42 = vld [vmem:[%s5143_s1 + $0x8] sm:$0x3] }
  0xb4   : > { %v3574_v2 = vcombine.low %v741_v61, %v755_v50  ;;  %v952_v5 = vshll.u32 %v4403_v29, 16  ;;  %v962_v47 = vshrl.u32 %v4413_v53, 16  ;;  %v975_v57 = vshrl.u32 %v4415_v54, 16 }
  0xb5   : > { %3839 = vmatmul.mubr.msk.bf16.gmra.mrb[4].mxu0 %vm507_vm2, %v3567_v30  ;;  %v3575_v9 = vcombine.low %v769_v55, %v783_v56  ;;  %v792_v10 = vrot.slane %v791_v49, 4  ;;  %v806_v11 = vrot.slane %v805_v51, 4  ;;  %v941_v12 = vor.u32 %v939_v63, %v938_v52 }
  0xb6   : > { %3844 = vmatprep.mubr.msk.bf16.mxu0 %vm507_vm2, %v3573_v31  ;;  %v3582_v13 = vrot.slane %v944_v48, 11  ;;  %v954_v14 = vor.u32 %v952_v5, %v951_v4  ;;  %v988_v15 = vshrl.u32 %v4426_v0, 16  ;;  %v1001_v16 = vshrl.u32 %v4428_v1, 16 }
  0xb7   : > { %v957_v17 = vshrl.u32 %v918_v22, 16  ;;  %v970_v18 = vshrl.u32 %v920_v59, 16  ;;  %v983_v19 = vshrl.u32 %v922_v60, 16  ;;  %v996_v7 = vshrl.u32 %v924_v6, 16 }
  0xb8   : > { %v964_v23 = vrot.slane %v962_v47, 7  ;;  %v965_v8 = vshll.u32 %v4413_v53, 16  ;;  %v977_v26 = vrot.slane %v975_v57, 7  ;;  %v978_v27 = vshll.u32 %v4415_v54, 16 }
  0xb9   : > { %v797_v28 = vsel %vm4372_vm8, %v792_v10, %v796_v45  ;;  %v811_v30 = vsel %vm4372_vm8, %v806_v11, %v810_v58  ;;  %v942_v31 = vsel %vm4306_vm5, %v3581_v46, %v941_v12  ;;  %v991_v32 = vshll.u32 %v4426_v0, 16  ;;  %v926_v45 = vld [vmem:[#allocation2 + $0x54] sm:$0x8]  ;;  %v928_v46 = vld [vmem:[#allocation2 + $0x60] sm:$0x8] }
  0xba   : > { %v955_v20 = vsel %vm4306_vm5, %v3582_v13, %v954_v14  ;;  %v990_v34 = vrot.slane %v988_v15, 7  ;;  %v1003_v35 = vrot.slane %v1001_v16, 7  ;;  %v1004_v36 = vshll.u32 %v4428_v1, 16  ;;  %v3607_v12 = vld [vmem:[%s5143_s1 + $0xa] sm:$0x3] }
  0xbb   : > { %v3583_v37 = vrot.slane %v957_v17, 11  ;;  %v3576_v39 = vcombine.low %v797_v28, %v811_v30  ;;  %v967_v40 = vor.u32 %v965_v8, %v964_v23  ;;  %v3584_v41 = vrot.slane %v970_v18, 11  ;;  %v1246_v13 = vld [vmem:[#allocation2 + $0x10] sm:$0xf]  ;;  %v1248_v14 = vld [vmem:[#allocation2 + $0x1c] sm:$0xf] }
  0xbc   : > { %v980_v43 = vor.u32 %v978_v27, %v977_v26  ;;  %v3590_v44 = vcombine.low %v942_v31, %v955_v20  ;;  %v1014_v48 = vshrl.u32 %v4450_v33, 16  ;;  %v1027_v50 = vshrl.u32 %v4455_v21, 16  ;;  %v1247_v18 = vld [vmem:[#allocation2 + $0x14] sm:$0x1]  ;;  %v1249_v23 = vld [vmem:[#allocation2 + $0x20] sm:$0x1] }
  0xbd   : > { %3845 = vmatmul.mubr.msk.bf16.vlgmr.msra.gmra.mrb[0].mxu0 %vm507_vm2, %v3574_v2  ;;  %v3585_v49 = vrot.slane %v983_v19, 11  ;;  %v993_v51 = vor.u32 %v991_v32, %v990_v34  ;;  %v3586_v52 = vrot.slane %v996_v7, 11  ;;  %v1006_v55 = vor.u32 %v1004_v36, %v1003_v35  ;;  %v1250_v28 = vld [vmem:[#allocation2 + $0x28] sm:$0xf]  ;;  %v1252_v34 = vld [vmem:[#allocation2 + $0x34] sm:$0xf] }
  0xbe   : > { %3853 = vmatpush3.bf16.msra.mxu0 %v1061_v62  ;;  %3848 = vmatprep.mubr.msk.bf16.mxu0 %vm507_vm2, %v3575_v9  ;;  %v968_v56 = vsel %vm4306_vm5, %v3583_v37, %v967_v40  ;;  %v981_v58 = vsel %vm4306_vm5, %v3584_v41, %v980_v43  ;;  %v1009_v4 = vshrl.u32 %v926_v45, 16  ;;  %v1022_v22 = vshrl.u32 %v928_v46, 16  ;;  %v1256_v40 = vld [vmem:[#allocation2 + $0x4c] sm:$0xf]  ;;  %v4488_v46 = vld [vmem:[#allocation2 + $0x38] sm:$0x1] }
  0xbf   : > { %4088 = vmatprep.subr.msk.bf16.mxu0 %vm520_vm1, %v3598_v42  ;;  %v1016_v59 = vrot.slane %v1014_v48, 7  ;;  %v1017_v60 = vshll.u32 %v4450_v33, 16  ;;  %v1029_v61 = vrot.slane %v1027_v50, 7  ;;  %v1030_v62 = vshll.u32 %v4455_v21, 16  ;;  %v1251_v41 = vld [vmem:[#allocation2 + $0x2c] sm:$0x1] }
  0xc0   : > { %v994_v63 = vsel %vm4306_vm5, %v3585_v49, %v993_v51  ;;  %v1007_v2 = vsel %vm4306_vm5, %v3586_v52, %v1006_v55  ;;  %v3591_v5 = vcombine.low %v968_v56, %v981_v58  ;;  %v1171_v47 = vsel %vm520_vm1, %v3598_v42, 0  ;;  %v4490_v52 = vld [vmem:[#allocation2 + $0x18] sm:$0x8] }
  0xc1   : > { %v3587_v57 = vrot.slane %v1009_v4, 11  ;;  %v3592_v6 = vcombine.low %v994_v63, %v1007_v2  ;;  %v1019_v9 = vor.u32 %v1017_v60, %v1016_v59  ;;  %v3588_v10 = vrot.slane %v1022_v22, 11  ;;  %v4498_v22 = vld [vmem:[#allocation2 + $0x44] sm:$0x1]  ;;  %v4507_v63 = vld [vmem:[#allocation2 + $0x50] sm:$0x1] }
  0xc2   : > { %v1032_v11 = vor.u32 %v1030_v62, %v1029_v61  ;;  %v1263_v15 = vshrl.u32 %v1246_v13, 16  ;;  %v1266_v42 = vshll.u32 %v1246_v13, 16  ;;  %v1277_v19 = vshrl.u32 %v1248_v14, 16 }
  0xc3   : > { %v1020_v16 = vsel %vm4306_vm5, %v3587_v57, %v1019_v9  ;;  %v1280_v7 = vshll.u32 %v1248_v14, 16  ;;  %v3599_v26 = vcombine.low %v4401_v25, %v4403_v29  ;;  %v1272_v27 = vshll.u32 %v1247_v18, 16  ;;  %v4518_v57 = vld [vmem:[%s5143_s1 + $0xc] sm:$0x3] }
  0xc4   : > { %v1033_v17 = vsel %vm4306_vm5, %v3588_v10, %v1032_v11  ;;  %v1265_v30 = vrot.slane %v1263_v15, 4  ;;  %v1268_v31 = vrot.slane %v1266_v42, 5  ;;  %v1279_v32 = vrot.slane %v1277_v19, 4 }
  0xc5   : > { %3849 = vmatmul.mubr.msk.bf16.gmra.mrb[4].mxu0 %vm507_vm2, %v3576_v39  ;;  %v3593_v8 = vcombine.low %v1020_v16, %v1033_v17  ;;  %v1282_v20 = vrot.slane %v1280_v7, 5  ;;  %v1286_v35 = vshll.u32 %v1249_v23, 16  ;;  %v1291_v36 = vshrl.u32 %v1250_v28, 16  ;;  %v1254_v39 = vld [vmem:[#allocation2 + $0x40] sm:$0xf] }
  0xc6   : > { %3854 = vmatprep.mubr.msk.bf16.mxu0 %vm507_vm2, %v3590_v44  ;;  %v1294_v37 = vshll.u32 %v1250_v28, 16  ;;  %v1305_v43 = vshrl.u32 %v1252_v34, 16  ;;  %v1308_v44 = vshll.u32 %v1252_v34, 16  ;;  %v1269_v25 = vor.u32 %v1268_v31, %v1265_v30  ;;  %v1259_v31 = vld [vmem:[#allocation2 + $0x5c] sm:$0x1] }
  0xc7   : > { %v4486_v29 = vrot.slane %v1272_v27, 5  ;;  %v1283_v45 = vor.u32 %v1282_v20, %v1279_v32  ;;  %v1319_v48 = vshrl.u32 %v1254_v39, 16  ;;  %v1322_v50 = vshll.u32 %v1254_v39, 16  ;;  %v4608_v32 = vld [vmem:[#allocation2 + $0x28] sm:$0xf] }
  0xc8   : > { %v1333_v49 = vshrl.u32 %v1256_v40, 16  ;;  %v1336_v51 = vshll.u32 %v1256_v40, 16  ;;  %v4492_v55 = vrot.slane %v1286_v35, 5  ;;  %v4494_v56 = vrot.slane %v1291_v36, 4  ;;  %v1261_v35 = vld [vmem:[#allocation2 + $0x68] sm:$0x1] }
  0xc9   : > { %v4496_v58 = vrot.slane %v1294_v37, 5  ;;  %v1300_v4 = vshll.u32 %v1251_v41, 16  ;;  %v3600_v59 = vcombine.low %v4413_v53, %v4415_v54  ;;  %v1401_v60 = vsel %vm520_vm1, %v3607_v12, 0  ;;  %v1258_v53 = vld [vmem:[#allocation2 + $0x58] sm:$0xf] }
  0xca   : > { %v4503_v61 = vrot.slane %v1305_v43, 4  ;;  %v4505_v62 = vrot.slane %v1308_v44, 5  ;;  %v3601_v2 = vcombine.low %v4426_v0, %v4428_v1  ;;  %v4521_v54 = vrot.slane %v1319_v48, 4  ;;  %v1260_v0 = vld [vmem:[#allocation2 + $0x64] sm:$0xf] }
  0xcb   : > { %v4525_v9 = vrot.slane %v1333_v49, 4  ;;  %v4527_v10 = vrot.slane %v1336_v51, 5  ;;  %v1297_v1 = vor.u32 %v4496_v58, %v4494_v56  ;;  %v1314_v11 = vshll.u32 %v4488_v46, 16  ;;  %v4610_v44 = vld [vmem:[#allocation2 + $0x1c] sm:$0xf] }
  0xcc   : > { %v1494_v13 = vshrl.u32 %v4490_v52, 16  ;;  %v1311_v14 = vor.u32 %v4505_v62, %v4503_v61  ;;  %v1347_v15 = vshrl.u32 %v1258_v53, 16  ;;  %v1350_v42 = vshll.u32 %v1258_v53, 16  ;;  %v4623_v58 = vld [vmem:[#allocation2 + $0x34] sm:$0xf] }
  0xcd   : > { %3855 = vmatmul.mubr.msk.bf16.vlgmr.msra.gmra.mrb[0].mxu0 %vm507_vm2, %v3591_v5  ;;  %v4511_v5 = vrot.slane %v1269_v25, 4  ;;  %v4539_v16 = vrot.slane %v1300_v4, 5  ;;  %v1342_v17 = vshll.u32 %v4507_v63, 16  ;;  %v1361_v18 = vshrl.u32 %v1260_v0, 16  ;;  %v1479_v25 = vld [vmem:[#allocation2 + $0x24] sm:$0x8] }
  0xce   : > { %3863 = vmatpush3.bf16.msra.mxu0 %v1171_v47  ;;  %3858 = vmatprep.mubr.msk.bf16.mxu0 %vm507_vm2, %v3592_v6  ;;  %v4513_v47 = vrot.slane %v1283_v45, 4  ;;  %v4523_v6 = vrot.slane %v1322_v50, 5  ;;  %v1364_v19 = vshll.u32 %v1260_v0, 16  ;;  %v3602_v27 = vcombine.low %v4450_v33, %v4455_v21  ;;  %v1481_v61 = vld [vmem:[#allocation2 + $0x30] sm:$0x8] }
  0xcf   : > { %4089 = vmatprep.subr.msk.bf16.mxu0 %vm520_vm1, %v3607_v12  ;;  %v1328_v12 = vshll.u32 %v4498_v22, 16  ;;  %v1275_v7 = vsel %vm4372_vm8, %v4511_v5, %v4486_v29  ;;  %v1316_v28 = vrot.slane %v1314_v11, 5  ;;  %v1298_v20 = vrot.slane %v1297_v1, 4  ;;  %v1483_v62 = vld [vmem:[#allocation2 + $0x3c] sm:$0x8] }
  0xd0   : > { %v1289_v23 = vsel %vm4372_vm8, %v4513_v47, %v4492_v55  ;;  %v1312_v34 = vrot.slane %v1311_v14, 4  ;;  %v1349_v36 = vrot.slane %v1347_v15, 4  ;;  %v1352_v37 = vrot.slane %v1350_v42, 5  ;;  %v4629_v63 = vld [vmem:[#allocation2 + $0x40] sm:$0xf] }
  0xd1   : > { %v1330_v30 = vrot.slane %v1328_v12, 5  ;;  %v3608_v39 = vcombine.low %v1275_v7, %v1289_v23  ;;  %v1344_v40 = vrot.slane %v1342_v17, 5  ;;  %v1363_v41 = vrot.slane %v1361_v18, 4  ;;  %v4633_v53 = vld [vmem:[#allocation2 + $0x4c] sm:$0xf] }
  0xd2   : > { %v1366_v43 = vrot.slane %v1364_v19, 5  ;;  %v1356_v21 = vshll.u32 %v1259_v31, 16  ;;  %v1512_v29 = vshrl.u32 %v4608_v32, 16  ;;  %v1370_v45 = vshll.u32 %v1261_v35, 16  ;;  %v1487_v1 = vld [vmem:[#allocation2 + $0x54] sm:$0x8] }
  0xd3   : > { %v1303_v46 = vsel %vm4372_vm8, %v1298_v20, %v4539_v16  ;;  %v1317_v48 = vsel %vm4372_vm8, %v1312_v34, %v1316_v28  ;;  %v1353_v50 = vor.u32 %v1352_v37, %v1349_v36  ;;  %v1499_v49 = vshrl.u32 %v4610_v44, 16  ;;  %v3633_v14 = vld [vmem:[%s5143_s1 + $0xe] sm:$0x3]  ;;  %v4656_v35 = vld [vmem:[#allocation2 + $0x70] sm:$0xf] }
  0xd4   : > { %v1367_v51 = vor.u32 %v1366_v43, %v1363_v41  ;;  %v3616_v55 = vrot.slane %v1494_v13, 11  ;;  %v1507_v56 = vshrl.u32 %v1479_v25, 16  ;;  %v3609_v5 = vcombine.low %v1303_v46, %v1317_v48  ;;  %v4661_v41 = vld [vmem:[#allocation2 + $0x64] sm:$0xf]  ;;  %v1489_v48 = vld [vmem:[#allocation2 + $0x60] sm:$0x8] }
  0xd5   : > { %3859 = vmatmul.mubr.msk.bf16.gmra.mrb[4].mxu0 %vm507_vm2, %v3593_v8  ;;  %v1325_v8 = vor.u32 %v4523_v6, %v4521_v54  ;;  %v1624_v52 = vsel %vm520_vm1, %v4518_v57, 0  ;;  %v1372_v47 = vrot.slane %v1370_v45, 5  ;;  %v4635_v54 = vld [vmem:[#allocation2 + $0x58] sm:$0xf]  ;;  %v1354_v6 = vrot.slane %v1353_v50, 4 }
  0xd6   : > { %3864 = vmatprep.mubr.msk.bf16.mxu0 %vm507_vm2, %v3599_v26  ;;  %v1339_v26 = vor.u32 %v4527_v10, %v4525_v9  ;;  %v1501_v9 = vrot.slane %v1499_v49, 7  ;;  %v1515_v10 = vshll.u32 %v4608_v32, 16  ;;  %v1525_v0 = vshrl.u32 %v4623_v58, 16  ;;  %v1491_v50 = vld [vmem:[#allocation2 + $0x6c] sm:$0x8] }
  0xd7   : > { %v1326_v3 = vrot.slane %v1325_v8, 4  ;;  %v1368_v12 = vrot.slane %v1367_v51, 4  ;;  %v3617_v13 = vrot.slane %v1507_v56, 11  ;;  %v1502_v15 = vshll.u32 %v4610_v44, 16 }
  0xd8   : > { %v1340_v33 = vrot.slane %v1339_v26, 4  ;;  %v1551_v16 = vshrl.u32 %v4633_v53, 16  ;;  %v1564_v17 = vshrl.u32 %v4635_v54, 16  ;;  %v1520_v18 = vshrl.u32 %v1481_v61, 16 }
  0xd9   : > { %v1331_v4 = vsel %vm4372_vm8, %v1326_v3, %v1330_v30  ;;  %v1533_v19 = vshrl.u32 %v1483_v62, 16  ;;  %v1559_v23 = vshrl.u32 %v1487_v1, 16  ;;  %v1504_v26 = vor.u32 %v1502_v15, %v1501_v9  ;;  %v1811_v15 = vld [vmem:[#allocation2 + $0x28] sm:$0xf] }
  0xda   : > { %v1345_v22 = vsel %vm4372_vm8, %v1340_v33, %v1344_v40  ;;  %v1528_v28 = vshll.u32 %v4623_v58, 16  ;;  %v1373_v30 = vsel %vm4372_vm8, %v1368_v12, %v1372_v47  ;;  %v1541_v20 = vshll.u32 %v4629_v63, 16 }
  0xdb   : > { %v3610_v11 = vcombine.low %v1331_v4, %v1345_v22  ;;  %v1554_v34 = vshll.u32 %v4633_v53, 16  ;;  %v1553_v37 = vrot.slane %v1551_v16, 7  ;;  %v1567_v40 = vshll.u32 %v4635_v54, 16  ;;  %v1809_v16 = vld [vmem:[#allocation2 + $0x1c] sm:$0xf] }
  0xdc   : > { %v3618_v43 = vrot.slane %v1520_v18, 11  ;;  %v1505_v33 = vsel %vm4306_vm5, %v3616_v55, %v1504_v26  ;;  %v1590_v25 = vshrl.u32 %v4656_v35, 16  ;;  %v1577_v49 = vshrl.u32 %v4661_v41, 16 }
  0xdd   : > { %3865 = vmatmul.mubr.msk.bf16.vlgmr.msra.gmra.mrb[0].mxu0 %vm507_vm2, %v3600_v59  ;;  %v1358_v59 = vrot.slane %v1356_v21, 5  ;;  %v3619_v21 = vrot.slane %v1533_v19, 11  ;;  %v1556_v56 = vor.u32 %v1554_v34, %v1553_v37  ;;  %v3621_v4 = vrot.slane %v1559_v23, 11  ;;  %v1810_v37 = vld [vmem:[#allocation2 + $0x20] sm:$0x1] }
  0xde   : > { %3873 = vmatpush3.bf16.msra.mxu0 %v1401_v60  ;;  %3868 = vmatprep.mubr.msk.bf16.mxu0 %vm507_vm2, %v3601_v2  ;;  %v1514_v60 = vrot.slane %v1512_v29, 7  ;;  %v1485_v2 = vld [vmem:[#allocation2 + $0x48] sm:$0x8]  ;;  %v1585_v55 = vshrl.u32 %v1491_v50, 16  ;;  %v1593_v61 = vshll.u32 %v4656_v35, 16  ;;  %v1843_v18 = vshll.u32 %v1811_v15, 16 }
  0xdf   : > { %4090 = vmatprep.subr.msk.bf16.mxu0 %vm520_vm1, %v4518_v57  ;;  %v1538_v57 = vshrl.u32 %v4629_v63, 16  ;;  %v1546_v7 = vshrl.u32 %v1485_v2, 16  ;;  %v1359_v8 = vsel %vm4372_vm8, %v1354_v6, %v1358_v59  ;;  %v1572_v59 = vshrl.u32 %v1489_v48, 16 }
  0xe0   : > { %v1517_v42 = vor.u32 %v1515_v10, %v1514_v60  ;;  %v3611_v3 = vcombine.low %v1359_v8, %v1373_v30  ;;  %v1592_v60 = vrot.slane %v1590_v25, 7  ;;  %v1734_v10 = vsel %vm520_vm1, %v3633_v14, 0 }
  0xe1   : > { %v1540_v31 = vrot.slane %v1538_v57, 7  ;;  %v3620_v51 = vrot.slane %v1546_v7, 11  ;;  %v3623_v12 = vrot.slane %v1585_v55, 11  ;;  %v3642_v57 = vld [vmem:[%s5143_s1 + $0x10] sm:$0x3]  ;;  %v1826_v23 = vshrl.u32 %v1809_v16, 16 }
  0xe2   : > { %v1518_v36 = vsel %vm4306_vm5, %v3617_v13, %v1517_v42  ;;  %v1595_v13 = vor.u32 %v1593_v61, %v1592_v60  ;;  %v1812_v7 = vld [vmem:[#allocation2 + $0x2c] sm:$0x1]  ;;  %v1829_v8 = vshll.u32 %v1809_v16, 16  ;;  %v3634_v26 = vcombine.low %v4610_v44, %v4608_v32  ;;  %v1823_v55 = vld [vmem:[#allocation2 + $0x70] sm:$0xf] }
  0xe3   : > { %v3625_v29 = vcombine.low %v1505_v33, %v1518_v36  ;;  %v1543_v46 = vor.u32 %v1541_v20, %v1540_v31  ;;  %v1557_v47 = vsel %vm4306_vm5, %v3620_v51, %v1556_v56  ;;  %v1845_v30 = vrot.slane %v1843_v18, 5  ;;  %v1815_v31 = vld [vmem:[#allocation2 + $0x40] sm:$0xf]  ;;  %v1817_v20 = vld [vmem:[#allocation2 + $0x4c] sm:$0xf] }
  0xe4   : > { %v1596_v42 = vsel %vm4306_vm5, %v3623_v12, %v1595_v13  ;;  %v1849_v34 = vshll.u32 %v1812_v7, 16  ;;  %v1819_v36 = vld [vmem:[#allocation2 + $0x58] sm:$0xf]  ;;  %v1868_v33 = vshrl.u32 %v1815_v31, 16  ;;  %v1882_v25 = vshrl.u32 %v1817_v20, 16 }
  0xe5   : > { %3869 = vmatmul.mubr.msk.bf16.gmra.mrb[4].mxu0 %vm507_vm2, %v3602_v27  ;;  %v1527_v27 = vrot.slane %v1525_v0, 7  ;;  %v1544_v2 = vsel %vm4306_vm5, %v3619_v21, %v1543_v46  ;;  %v3622_v0 = vrot.slane %v1572_v59, 11  ;;  %v1871_v21 = vshll.u32 %v1815_v31, 16 }
  0xe6   : > { %3874 = vmatprep.mubr.msk.bf16.mxu0 %vm507_vm2, %v3608_v39  ;;  %v1566_v39 = vrot.slane %v1564_v17, 7  ;;  %v1840_v17 = vshrl.u32 %v1811_v15, 16  ;;  %v1885_v44 = vshll.u32 %v1817_v20, 16  ;;  %v1964_v46 = vsel %vm520_vm1, %v3642_v57, 0  ;;  %v1822_v20 = vld [vmem:[#allocation2 + $0x68] sm:$0x1] }
  0xe7   : > { %v1530_v45 = vor.u32 %v1528_v28, %v1527_v27  ;;  %v1813_v27 = vld [vmem:[#allocation2 + $0x34] sm:$0xf]  ;;  %v1835_v48 = vshll.u32 %v1810_v37, 16  ;;  %v1851_v50 = vrot.slane %v1849_v34, 5  ;;  %v3635_v51 = vcombine.low %v4623_v58, %v4629_v63 }
  0xe8   : > { %v1569_v22 = vor.u32 %v1567_v40, %v1566_v39  ;;  %v1842_v28 = vrot.slane %v1840_v17, 4  ;;  %v1828_v39 = vrot.slane %v1826_v23, 4  ;;  %v1831_v40 = vrot.slane %v1829_v8, 5 }
  0xe9   : > { %v1531_v62 = vsel %vm4306_vm5, %v3618_v43, %v1530_v45  ;;  %v1854_v43 = vshrl.u32 %v1813_v27, 16  ;;  %v1899_v45 = vshll.u32 %v1819_v36, 16  ;;  %v3636_v60 = vcombine.low %v4633_v53, %v4635_v54 }
  0xea   : > { %v1570_v6 = vsel %vm4306_vm5, %v3621_v4, %v1569_v22  ;;  %v3626_v9 = vcombine.low %v1531_v62, %v1544_v2  ;;  %v1846_v32 = vor.u32 %v1845_v30, %v1842_v28  ;;  %v1832_v56 = vor.u32 %v1831_v40, %v1828_v39  ;;  %v1816_v4 = vld [vmem:[#allocation2 + $0x44] sm:$0x1]  ;;  %v1818_v2 = vld [vmem:[#allocation2 + $0x50] sm:$0x1] }
  0xeb   : > { %v3627_v1 = vcombine.low %v1557_v47, %v1570_v6  ;;  %v1856_v22 = vrot.slane %v1854_v43, 4  ;;  %v1870_v61 = vrot.slane %v1868_v33, 4  ;;  %v1873_v62 = vrot.slane %v1871_v21, 5 }
  0xec   : > { %v1887_v47 = vrot.slane %v1885_v44, 5  ;;  %v1877_v63 = vshll.u32 %v1816_v4, 16  ;;  %v1837_v53 = vrot.slane %v1835_v48, 5  ;;  %v1927_v12 = vshll.u32 %v1823_v55, 16 }
  0xed   : > { %3875 = vmatmul.mubr.msk.bf16.vlgmr.msra.gmra.mrb[0].mxu0 %vm507_vm2, %v3609_v5  ;;  %v1579_v5 = vrot.slane %v1577_v49, 7  ;;  %v1814_v49 = vld [vmem:[#allocation2 + $0x38] sm:$0x1]  ;;  %v1874_v13 = vor.u32 %v1873_v62, %v1870_v61  ;;  %v3637_v8 = vcombine.low %v4661_v41, %v4656_v35  ;;  %v1919_v35 = vshll.u32 %v1822_v20, 16 }
  0xee   : > { %3883 = vmatpush3.bf16.msra.mxu0 %v1624_v52  ;;  %3878 = vmatprep.mubr.msk.bf16.mxu0 %vm507_vm2, %v3610_v11  ;;  %v1580_v52 = vshll.u32 %v4661_v41, 16  ;;  %v1863_v58 = vshll.u32 %v1814_v49, 16  ;;  %v1879_v7 = vrot.slane %v1877_v63, 5  ;;  %v1929_v28 = vrot.slane %v1927_v12, 5 }
  0xef   : > { %4091 = vmatprep.subr.msk.bf16.mxu0 %vm520_vm1, %v3633_v14  ;;  %v1875_v31 = vrot.slane %v1874_v13, 4 }
  0xf0   : > { %v1582_v11 = vor.u32 %v1580_v52, %v1579_v5  ;;  %v1884_v5 = vrot.slane %v1882_v25, 4  ;;  %v1847_v52 = vrot.slane %v1846_v32, 4 }
  0xf1   : > { %v1880_v21 = vsel %vm4372_vm8, %v1875_v31, %v1879_v7 }
  0xf2   : > { %v1583_v14 = vsel %vm4306_vm5, %v3622_v0, %v1582_v11  ;;  %v1820_v0 = vld [vmem:[#allocation2 + $0x5c] sm:$0x1]  ;;  %v1833_v11 = vrot.slane %v1832_v56, 4  ;;  %v1888_v16 = vor.u32 %v1887_v47, %v1884_v5 }
  0xf3   : > { %v3628_v19 = vcombine.low %v1583_v14, %v1596_v42  ;;  %v1852_v42 = vsel %vm4372_vm8, %v1847_v52, %v1851_v50  ;;  %v1905_v18 = vshll.u32 %v1820_v0, 16 }
  0xf4   : > { %v1889_v37 = vrot.slane %v1888_v16, 4 }
  0xf5   : > { %3879 = vmatmul.mubr.msk.bf16.gmra.mrb[4].mxu0 %vm507_vm2, %v3611_v3  ;;  %v1857_v3 = vshll.u32 %v1813_v27, 16  ;;  %v1907_v43 = vrot.slane %v1905_v18, 5 }
  0xf6   : > { %3884 = vmatprep.mubr.msk.bf16.mxu0 %vm507_vm2, %v3625_v29  ;;  %v1896_v29 = vshrl.u32 %v1819_v36, 16 }
  0xf7   : > { %v1859_v59 = vrot.slane %v1857_v3, 5  ;;  %v1824_v3 = vld [vmem:[#allocation2 + $0x74] sm:$0x1] }
  0xf8   : > { %v1898_v6 = vrot.slane %v1896_v29, 4  ;;  %v1933_v32 = vshll.u32 %v1824_v3, 16 }
  0xf9   : > { %v1860_v54 = vor.u32 %v1859_v59, %v1856_v22  ;;  %v4156_v59 = vmov 0.0  }
  0xfa   : > { %3912 = vmatprep.subr.bf16.mxu1 %v4156_v59  ;;  %3920 = vmatprep.mubr.msk.bf16.mxu1 %vm4157_vm10, %v4156_v59 }
  0xfb   : > { %v1861_v27 = vrot.slane %v1860_v54, 4 }
  0xfd   : > { %3885 = vmatmul.mubr.msk.bf16.vlgmr.msra.gmra.mrb[0].mxu0 %vm507_vm2, %v3626_v9  ;;  %v1901_v9 = vrot.slane %v1899_v45, 5 }
  0xfe   : > { %3893 = vmatpush3.bf16.msra.mxu0 %v1734_v10  ;;  %3888 = vmatprep.mubr.msk.bf16.mxu0 %vm507_vm2, %v3627_v1  ;;  %v1821_v10 = vld [vmem:[#allocation2 + $0x64] sm:$0xf]  ;;  %v1924_v1 = vshrl.u32 %v1823_v55, 16  ;;  %v3651_v55 = vld [vmem:[%s5145_s3] ss:$0 sm:$0xff] }
  0xff   : > { %4092 = vmatprep.subr.msk.bf16.mxu0 %vm520_vm1, %v3642_v57  ;;  %v1891_v57 = vshll.u32 %v1818_v2, 16  ;;  %v1910_v15 = vshrl.u32 %v1821_v10, 16  ;;  %v1913_v14 = vshll.u32 %v1821_v10, 16  ;;  %v1902_v17 = vor.u32 %v1901_v9, %v1898_v6 }
 0x100   : > { %v1926_v23 = vrot.slane %v1924_v1, 4 }
 0x101   : > { %v1912_v34 = vrot.slane %v1910_v15, 4  ;;  %v1915_v36 = vrot.slane %v1913_v14, 5  ;;  %v1893_v39 = vrot.slane %v1891_v57, 5  ;;  %v1903_v40 = vrot.slane %v1902_v17, 4  ;;  %v4737_v17 = vld [vmem:[#allocation3 + $0x4] sm:$0xf] }
 0x102   : > { %v1930_v41 = vor.u32 %v1929_v28, %v1926_v23  ;;  %v2105_v3 = vshll.u32 %v4737_v17, 16 }
 0x103   : > { %v1916_v25 = vor.u32 %v1915_v36, %v1912_v34  ;;  %v1894_v44 = vsel %vm4372_vm8, %v1889_v37, %v1893_v39  ;;  %v1908_v29 = vsel %vm4372_vm8, %v1903_v40, %v1907_v43  ;;  %v2812_v36 = vld [vmem:[#allocation3 + $0x14] sm:$0x1]  ;;  %v2814_v39 = vld [vmem:[#allocation3 + $0x20] sm:$0x1] }
 0x104   : > { %v3645_v48 = vcombine.low %v1894_v44, %v1908_v29  ;;  %v1931_v49 = vrot.slane %v1930_v41, 4  ;;  %v2816_v41 = vld [vmem:[#allocation3 + $0x2c] sm:$0x1]  ;;  %v2839_v44 = vshll.u32 %v2812_v36, 16 }
 0x105   : > { %3889 = vmatmul.mubr.msk.bf16.gmra.mrb[4].mxu0 %vm507_vm2, %v3628_v19  ;;  %v1865_v19 = vrot.slane %v1863_v58, 5  ;;  %v1917_v50 = vrot.slane %v1916_v25, 4 }
 0x106   : > { %3894 = vmatprep.mubr.msk.bf16.mxu0 %vm507_vm2, %v3634_v26  ;;  %v1838_v26 = vsel %vm4372_vm8, %v1833_v11, %v1837_v53 }
 0x107   : > { %v3643_v30 = vcombine.low %v1838_v26, %v1852_v42  ;;  %v1866_v33 = vsel %vm4372_vm8, %v1861_v27, %v1865_v19  ;;  %v2102_v27 = vshrl.u32 %v4737_v17, 16 }
 0x108   : > { %v3644_v45 = vcombine.low %v1866_v33, %v1880_v21 }
 0x109   : > { %v2104_v43 = vrot.slane %v2102_v27, 7  ;;  %v2824_v27 = vld [vmem:[#allocation3 + $0x5c] sm:$0x1] }
 0x10d   : > { %3895 = vmatmul.mubr.msk.bf16.vlgmr.msra.gmra.mrb[0].mxu0 %vm507_vm2, %v3635_v51  ;;  %v1935_v51 = vrot.slane %v1933_v32, 5 }
 0x10e   : > { %3903 = vmatpush3.bf16.msra.mxu0 %v1964_v46  ;;  %3898 = vmatprep.mubr.msk.bf16.mxu0 %vm507_vm2, %v3636_v60  ;;  %v1921_v46 = vrot.slane %v1919_v35, 5 }
 0x10f   : > { %v1936_v4 = vsel %vm4372_vm8, %v1931_v49, %v1935_v51  ;;  %3972 = vmatprep.subr.bf16.mxu0 %v4156_v59  ;;  %v2818_v51 = vld [vmem:[#allocation3 + $0x38] sm:$0x1] }
 0x110   : > { %v1922_v56 = vsel %vm4372_vm8, %v1917_v50, %v1921_v46  ;;  %v2853_v46 = vshll.u32 %v2814_v39, 16 }
 0x111   : > { %v3646_v22 = vcombine.low %v1922_v56, %v1936_v4  ;;  %v2867_v56 = vshll.u32 %v2816_v41, 16 }
 0x115   : > { %3899 = vmatmul.mubr.msk.bf16.gmra.mrb[4].mxu0 %vm507_vm2, %v3637_v8 }
 0x116   : > { %3904 = vmatprep.mubr.msk.bf16.mxu0 %vm507_vm2, %v3643_v30 }
 0x11d   : > { %3905 = vmatmul.mubr.msk.bf16.vlgmr.msra.gmra.mrb[0].mxu0 %vm507_vm2, %v3644_v45 }
 0x11e   : > { %3908 = vmatprep.mubr.msk.bf16.mxu0 %vm507_vm2, %v3645_v48 }
 0x125   : > { %3909 = vmatmul.mubr.msk.bf16.gmra.mrb[4].mxu0 %vm507_vm2, %v3646_v22 }
 0x126   : > { %3980 = vmatprep.mubr.msk.bf16.mxu0 %vm4157_vm10, %v4156_v59 }
 0x1f0   : > { %v3906_v60 = vpop.f32.mrb[0].mxu0 }
 0x1f1   : > { %v2048_v61 = vadd.f32 %v3906_v60, %v3651_v55  ;;  %v2000_v62 = vpop.f32.mrb[1].mxu0 }
 0x1f2   : > { %v2046_v2 = vadd.f32 %v3651_v55, %v2000_v62  ;;  %v3907_v5 = vpop.f32.mrb[2].mxu0 }
 0x1f3   : > { %v2056_v52 = vmax.f32 %v2048_v61, 0.0  ;;  %v2049_v47 = vadd.f32 %v3907_v5, %v3651_v55  ;;  %v2003_v6 = vpop.f32.mrb[3].mxu0  ;;  %v2820_v5 = vld [vmem:[#allocation3 + $0x44] sm:$0x1] }
 0x1f4   : > { %v2054_v9 = vmax.f32 %v2046_v2, 0.0  ;;  %v2047_v10 = vadd.f32 %v3651_v55, %v2003_v6 }
 0x1f5   : > { %v2064_v58 = vpack.c.bf16 %v2056_v52, %v2056_v52  ;;  %v2057_v63 = vmax.f32 %v2049_v47, 0.0  ;;  %v2822_v52 = vld [vmem:[#allocation3 + $0x50] sm:$0x1]  ;;  %v2841_v47 = vrot.slane %v2839_v44, 5 }
 0x1f6   : > { %v2062_v0 = vpack.c.bf16 %v2054_v9, %v2054_v9  ;;  %v2055_v1 = vmax.f32 %v2047_v10, 0.0  ;;  %v2855_v9 = vrot.slane %v2853_v46, 5  ;;  %v2881_v10 = vshll.u32 %v2818_v51, 16 }
 0x1f7   : > { %2073 = vst.msk [vmem:[#allocation3 + $0x28] sm:$0xf] %vm252_vm9, %v2064_v58  ;;  %v2065_v11 = vpack.c.bf16 %v2057_v63, %v2057_v63 }
 0x1f8   : > { %2071 = vst.msk [vmem:[#allocation3 + $0x10] sm:$0xf] %vm252_vm9, %v2062_v0  ;;  %v2063_v53 = vpack.c.bf16 %v2055_v1, %v2055_v1  ;;  %v3910_v54 = vpop.f32.mrb[4].mxu0  ;;  %v2869_v1 = vrot.slane %v2867_v56, 5 }
 0x1f9   : > { %2074 = vst.msk [vmem:[#allocation3 + $0x34] sm:$0xf] %vm252_vm9, %v2065_v11  ;;  %v2052_v12 = vadd.f32 %v3910_v54, %v3651_v55  ;;  %v2016_v13 = vpop.f32.mrb[5].mxu0  ;;  %v2079_v11 = vld [vmem:[#allocation3] sm:$0x8] }
 0x1fa   : > { %2072 = vst.msk [vmem:[#allocation3 + $0x1c] sm:$0xf] %vm252_vm9, %v2063_v53  ;;  %v2050_v57 = vadd.f32 %v3651_v55, %v2016_v13  ;;  %v3911_v15 = vpop.f32.mrb[6].mxu0  ;;  %v2895_v13 = vshll.u32 %v2820_v5, 16 }
 0x1fb   : > { %v2060_v14 = vmax.f32 %v2052_v12, 0.0  ;;  %v2053_v42 = vadd.f32 %v3911_v15, %v3651_v55  ;;  %v2019_v16 = vpop.f32.mrb[7].mxu0  ;;  %v4760_v15 = vor.u32 %v2105_v3, %v2104_v43 }
 0x1fc   : > { %v2058_v18 = vmax.f32 %v2050_v57, 0.0  ;;  %v2051_v19 = vadd.f32 %v3651_v55, %v2019_v16  ;;  %v2909_v57 = vshll.u32 %v2822_v52, 16 }
 0x1fd   : > { %v2068_v7 = vpack.c.bf16 %v2060_v14, %v2060_v14  ;;  %v2061_v23 = vmax.f32 %v2053_v42, 0.0 }
 0x1fe   : > { %v2066_v8 = vpack.c.bf16 %v2058_v18, %v2058_v18  ;;  %v2059_v26 = vmax.f32 %v2051_v19, 0.0  ;;  %v2815_v32 = vld [vmem:[#allocation3 + $0x28] sm:$0xf]  ;;  %v2081_v18 = vld [vmem:[#allocation3 + $0xc] sm:$0x8]  ;;  %v4774_v43 = vrot.slane %v2909_v57, 5 }
 0x1ff   : > { %2077 = vst.msk [vmem:[#allocation3 + $0x58] sm:$0xf] %vm252_vm9, %v2068_v7  ;;  %v2069_v28 = vpack.c.bf16 %v2061_v23, %v2061_v23  ;;  %v4741_v30 = vld [vmem:[#allocation3 + $0x10] sm:$0xf]  ;;  %v4753_v50 = vld [vmem:[#allocation3 + $0x28] sm:$0xf] }
 0x200   : > { %v2811_v31 = vld [vmem:[#allocation3 + $0x10] sm:$0xf]  ;;  %2075 = vst.msk [vmem:[#allocation3 + $0x40] sm:$0xf] %vm252_vm9, %v2066_v8  ;;  %v2067_v20 = vpack.c.bf16 %v2059_v26, %v2059_v26  ;;  %v3661_v34 = vcombine.low %v4737_v17, %v4741_v30  ;;  %v2817_v48 = vld [vmem:[#allocation3 + $0x34] sm:$0xf] }
 0x201   : > { %2078 = vst.msk [vmem:[#allocation3 + $0x64] sm:$0xf] %vm252_vm9, %v2069_v28  ;;  %v2813_v37 = vld [vmem:[#allocation3 + $0x1c] sm:$0xf]  ;;  %v2830_v40 = vshrl.u32 %v2811_v31, 16  ;;  %v2833_v25 = vshll.u32 %v2811_v31, 16 }
 0x202   : > { %2076 = vst.msk [vmem:[#allocation3 + $0x4c] sm:$0xf] %vm252_vm9, %v2067_v20  ;;  %v2227_v35 = vsel %vm2222_vm11, %v3661_v34, 0  ;;  %v4750_v33 = vld [vmem:[#allocation3 + $0x1c] sm:$0xf]  ;;  %v2844_v29 = vshrl.u32 %v2813_v37, 16 }
 0x203   : > { %3913 = vmatpush3.bf16.xpose.msra.mxu1 %v2227_v35  ;;  %v2832_v21 = vrot.slane %v2830_v40, 4  ;;  %v2847_v45 = vshll.u32 %v2813_v37, 16  ;;  %v2835_v49 = vrot.slane %v2833_v25, 5  ;;  %v3662_v4 = vcombine.low %v4750_v33, %v4753_v50  ;;  %v4768_v8 = vld [vmem:[#allocation3 + $0x34] sm:$0xf] }
 0x204   : > { %3914 = vmatprep.subr.bf16.mxu1 %v4156_v59  ;;  %v2846_v22 = vrot.slane %v2844_v29, 4  ;;  %v2858_v60 = vshrl.u32 %v2815_v32, 16  ;;  %v2861_v62 = vshll.u32 %v2815_v32, 16  ;;  %v2872_v2 = vshrl.u32 %v2817_v48, 16 }
 0x205   : > { %v2849_v55 = vrot.slane %v2847_v45, 5  ;;  %v2836_v61 = vor.u32 %v2835_v49, %v2832_v21  ;;  %v2230_v53 = vsel %vm2222_vm11, %v3662_v4, 0  ;;  %v2875_v16 = vshll.u32 %v2817_v48, 16 }
 0x206   : > { %v2860_v63 = vrot.slane %v2858_v60, 4  ;;  %v2863_v0 = vrot.slane %v2861_v62, 5  ;;  %v2874_v42 = vrot.slane %v2872_v2, 4  ;;  %v2115_v19 = vshrl.u32 %v4741_v30, 16  ;;  %v2823_v21 = vld [vmem:[#allocation3 + $0x58] sm:$0xf] }
 0x207   : > { %v2850_v6 = vor.u32 %v2849_v55, %v2846_v22  ;;  %v2837_v58 = vrot.slane %v2836_v61, 4  ;;  %v4758_v12 = vld [vmem:[#allocation3 + $0x40] sm:$0xf]  ;;  %v2097_v26 = vshrl.u32 %v2079_v11, 16  ;;  %v2877_v20 = vrot.slane %v2875_v16, 5 }
 0x208   : > { %v2864_v14 = vor.u32 %v2863_v0, %v2860_v63  ;;  %v2819_v17 = vld [vmem:[#allocation3 + $0x40] sm:$0xf]  ;;  %v3663_v31 = vcombine.low %v4768_v8, %v4758_v12  ;;  %v2883_v34 = vrot.slane %v2881_v10, 5  ;;  %v4772_v40 = vrot.slane %v2895_v13, 5  ;;  %v2825_v46 = vld [vmem:[#allocation3 + $0x64] sm:$0xf] }
 0x209   : > { %v2851_v54 = vrot.slane %v2850_v6, 4  ;;  %v2842_v7 = vsel %vm4372_vm8, %v2837_v58, %v2841_v47  ;;  %v2821_v37 = vld [vmem:[#allocation3 + $0x4c] sm:$0xf]  ;;  %v2886_v39 = vshrl.u32 %v2819_v17, 16  ;;  %v2878_v35 = vor.u32 %v2877_v20, %v2874_v42  ;;  %v2826_v58 = vld [vmem:[#allocation3 + $0x68] sm:$0x1] }
 0x20a   : > { %v2865_v36 = vrot.slane %v2864_v14, 4  ;;  %v2110_v41 = vshrl.u32 %v2081_v18, 16  ;;  %v2923_v25 = vshll.u32 %v2824_v27, 16  ;;  %v2117_v32 = vrot.slane %v2115_v19, 7  ;;  %v4785_v62 = vld [vmem:[#allocation3 + $0x4c] sm:$0xf] }
 0x20b   : > { %3915 = vmatpush3.bf16.xpose.msra.mxu1 %v2230_v53  ;;  %v2856_v23 = vsel %vm4372_vm8, %v2851_v54, %v2855_v9  ;;  %v2888_v44 = vrot.slane %v2886_v39, 4  ;;  %v2889_v29 = vshll.u32 %v2819_v17, 16  ;;  %v4777_v45 = vrot.slane %v2097_v26, 11  ;;  %v4790_v0 = vld [vmem:[#allocation3 + $0x58] sm:$0xf] }
 0x20c   : > { %3916 = vmatprep.subr.bf16.mxu1 %v4156_v59  ;;  %v3698_v28 = vcombine.low %v2842_v7, %v2856_v23  ;;  %v2233_v48 = vsel %vm2222_vm11, %v3663_v31, 0  ;;  %v2879_v49 = vrot.slane %v2878_v35, 4  ;;  %v2900_v51 = vshrl.u32 %v2821_v37, 16  ;;  %v2085_v19 = vld [vmem:[#allocation3 + $0x24] sm:$0x8] }
 0x20d   : > { %v2903_v56 = vshll.u32 %v2821_v37, 16  ;;  %v2870_v4 = vsel %vm4372_vm8, %v2865_v36, %v2869_v1  ;;  %v2891_v22 = vrot.slane %v2889_v29, 5  ;;  %v2914_v55 = vshrl.u32 %v2823_v21, 16  ;;  %v2345_v39 = vld [vmem:[#allocation3 + $0x4] sm:$0xf] }
 0x20e   : > { %v2957_v3 = vsel %vm2222_vm11, %v3698_v28, 0  ;;  %v2917_v60 = vshll.u32 %v2823_v21, 16  ;;  %v2884_v61 = vsel %vm4372_vm8, %v2879_v49, %v2883_v34  ;;  %v2902_v2 = vrot.slane %v2900_v51, 4  ;;  %v3660_v51 = vld [vmem:[%s5144_s2 + $0x4] sm:$0xf] }
 0x20f   : > { %3973 = vmatpush3.bf16.xpose.msra.mxu0 %v2957_v3  ;;  %v2905_v5 = vrot.slane %v2903_v56, 5  ;;  %v2928_v52 = vshrl.u32 %v2825_v46, 16  ;;  %v2118_v47 = vshll.u32 %v4741_v30, 16  ;;  %v3699_v6 = vcombine.low %v2870_v4, %v2884_v61  ;;  %v2083_v30 = vld [vmem:[#allocation3 + $0x18] sm:$0x8] }
 0x210   : > { %3974 = vmatprep.subr.bf16.mxu0 %v4156_v59  ;;  %v2892_v9 = vor.u32 %v2891_v22, %v2888_v44  ;;  %v3653_v10 = vrot.slane %v2110_v41, 11  ;;  %v2128_v63 = vshrl.u32 %v4750_v33, 16  ;;  %v2931_v53 = vshll.u32 %v2825_v46, 16  ;;  %v2091_v46 = vld [vmem:[#allocation3 + $0x48] sm:$0x8] }
 0x211   : > { %v2906_v1 = vor.u32 %v2905_v5, %v2902_v2  ;;  %v2930_v11 = vrot.slane %v2928_v52, 4  ;;  %v3664_v54 = vcombine.low %v4785_v62, %v4790_v0  ;;  %v2916_v57 = vrot.slane %v2914_v55, 4 }
 0x212   : > { %v2893_v13 = vrot.slane %v2892_v9, 4  ;;  %v2919_v14 = vrot.slane %v2917_v60, 5  ;;  %v2120_v42 = vor.u32 %v2118_v47, %v2117_v32  ;;  %v2960_v16 = vsel %vm2222_vm11, %v3699_v6, 0  ;;  %v2087_v32 = vld [vmem:[#allocation3 + $0x30] sm:$0x8] }
 0x213   : > { %3917 = vmatpush3.bf16.xpose.msra.mxu1 %v2233_v48  ;;  %v2907_v17 = vrot.slane %v2906_v1, 4  ;;  %v2933_v18 = vrot.slane %v2931_v53, 5  ;;  %v2925_v7 = vrot.slane %v2923_v25, 5  ;;  %v2937_v23 = vshll.u32 %v2826_v58, 16 }
 0x214   : > { %3918 = vmatprep.subr.bf16.mxu1 %v4156_v59  ;;  %v2141_v26 = vshrl.u32 %v4753_v50, 16  ;;  %v2123_v31 = vshrl.u32 %v2083_v30, 16  ;;  %v2236_v20 = vsel %vm2222_vm11, %v3664_v54, 0  ;;  %v2898_v34 = vsel %vm4372_vm8, %v2893_v13, %v4772_v40  ;;  %v2089_v40 = vld [vmem:[#allocation3 + $0x3c] sm:$0x8] }
 0x215   : > { %v2912_v27 = vsel %vm4372_vm8, %v2907_v17, %v4774_v43  ;;  %v2934_v28 = vor.u32 %v2933_v18, %v2930_v11  ;;  %v2920_v36 = vor.u32 %v2919_v14, %v2916_v57  ;;  %v2136_v37 = vshrl.u32 %v2085_v19, 16  ;;  %v2346_v57 = vld [vmem:[#allocation3 + $0x8] sm:$0x1]  ;;  %v2348_v14 = vld [vmem:[#allocation3 + $0x14] sm:$0x1] }
 0x216   : > { %v2130_v3 = vrot.slane %v2128_v63, 7  ;;  %v3700_v35 = vcombine.low %v2898_v34, %v2912_v27  ;;  %v2108_v41 = vsel %vm4306_vm5, %v4777_v45, %v4760_v15  ;;  %v2121_v43 = vsel %vm4306_vm5, %v3653_v10, %v2120_v42  ;;  %v3012_v18 = vld [vmem:[#allocation3 + $0x24] sm:$0x8]  ;;  %v2350_v27 = vld [vmem:[#allocation3 + $0x20] sm:$0x1] }
 0x217   : > { %3975 = vmatpush3.bf16.xpose.msra.mxu0 %v2960_v16  ;;  %v2935_v21 = vrot.slane %v2934_v28, 4  ;;  %v2939_v25 = vrot.slane %v2937_v23, 5  ;;  %v2131_v44 = vshll.u32 %v4750_v33, 16  ;;  %v2143_v29 = vrot.slane %v2141_v26, 7  ;;  %v2093_v33 = vld [vmem:[#allocation3 + $0x54] sm:$0x8] }
 0x218   : > { %3976 = vmatprep.subr.bf16.mxu0 %v4156_v59  ;;  %v2364_v48 = vshrl.u32 %v2345_v39, 16  ;;  %v2367_v49 = vshll.u32 %v2345_v39, 16  ;;  %v3666_v15 = vcombine.low %v2108_v41, %v2121_v43  ;;  %v2921_v45 = vrot.slane %v2920_v36, 4  ;;  %v3010_v28 = vld [vmem:[#allocation3 + $0x18] sm:$0x8] }
 0x219   : > { %v3654_v56 = vrot.slane %v2123_v31, 11  ;;  %v3655_v4 = vrot.slane %v2136_v37, 11  ;;  %v2133_v22 = vor.u32 %v2131_v44, %v2130_v3  ;;  %v2144_v55 = vshll.u32 %v4753_v50, 16  ;;  %v2352_v50 = vld [vmem:[#allocation3 + $0x2c] sm:$0x1] }
 0x21a   : > { %v2167_v60 = vshrl.u32 %v4758_v12, 16  ;;  %v2963_v61 = vsel %vm2222_vm11, %v3700_v35, 0  ;;  %v2940_v2 = vsel %vm4372_vm8, %v2935_v21, %v2939_v25  ;;  %v2149_v5 = vshrl.u32 %v2087_v32, 16  ;;  %v2347_v41 = vld [vmem:[#allocation3 + $0x10] sm:$0xf] }
 0x21b   : > { %3919 = vmatpush3.bf16.xpose.msra.mxu1 %v2236_v20  ;;  %v2162_v52 = vshrl.u32 %v2089_v40, 16  ;;  %v2175_v47 = vshrl.u32 %v2091_v46, 16  ;;  %v2146_v6 = vor.u32 %v2144_v55, %v2143_v29  ;;  %v2154_v9 = vshrl.u32 %v4768_v8, 16  ;;  %v4849_v29 = vld [vmem:[#allocation3 + $0x44] sm:$0x1] }
 0x21c   : > { %3924 = vmatprep.subr.bf16.mxu1 %v4156_v59  ;;  %v2366_v10 = vrot.slane %v2364_v48, 4  ;;  %v2369_v58 = vrot.slane %v2367_v49, 5  ;;  %v2294_v63 = vsel %vm2222_vm11, %v3666_v15, 0  ;;  %v2926_v1 = vsel %vm4372_vm8, %v2921_v45, %v2925_v7  ;;  %v3014_v46 = vld [vmem:[#allocation3 + $0x30] sm:$0x8] }
 0x21d   : > { %v2188_v11 = vshrl.u32 %v2093_v33, 16  ;;  %v2169_v53 = vrot.slane %v2167_v60, 7  ;;  %v3701_v54 = vcombine.low %v2926_v1, %v2940_v2  ;;  %v2134_v13 = vsel %vm4306_vm5, %v3654_v56, %v2133_v22  ;;  %v4852_v49 = vld [vmem:[#allocation3 + $0x28] sm:$0xf] }
 0x21e   : > { %v3656_v30 = vrot.slane %v2149_v5, 11  ;;  %v3657_v42 = vrot.slane %v2162_v52, 11  ;;  %v4831_v16 = vrot.slane %v2175_v47, 11  ;;  %v2415_v17 = vshll.u32 %v2352_v50, 16  ;;  %v3016_v5 = vld [vmem:[#allocation3 + $0x3c] sm:$0x8] }
 0x21f   : > { %3977 = vmatpush3.bf16.xpose.msra.mxu0 %v2963_v61  ;;  %v2156_v19 = vrot.slane %v2154_v9, 7  ;;  %v2170_v7 = vshll.u32 %v4758_v12, 16  ;;  %v2147_v23 = vsel %vm4306_vm5, %v3655_v4, %v2146_v6  ;;  %v2370_v26 = vor.u32 %v2369_v58, %v2366_v10  ;;  %v4841_v12 = vld [vmem:[#allocation3 + $0x1c] sm:$0xf]  ;;  %v3018_v10 = vld [vmem:[#allocation3 + $0x48] sm:$0x8] }
 0x220   : > { %3978 = vmatprep.subr.bf16.mxu0 %v4156_v59  ;;  %v3667_v31 = vcombine.low %v2134_v13, %v2147_v23  ;;  %v4836_v20 = vrot.slane %v2188_v11, 11  ;;  %v2373_v34 = vshll.u32 %v2346_v57, 16  ;;  %v2387_v36 = vshll.u32 %v2348_v14, 16  ;;  %v3697_v4 = vld [vmem:[%s5144_s2 + $0x14] sm:$0xf] }
 0x221   : > { %v2157_v37 = vshll.u32 %v4768_v8, 16  ;;  %v2172_v39 = vor.u32 %v2170_v7, %v2169_v53  ;;  %v2180_v3 = vshrl.u32 %v4785_v62, 16  ;;  %v2966_v35 = vsel %vm2222_vm11, %v3701_v54, 0  ;;  %v3020_v58 = vld [vmem:[#allocation3 + $0x54] sm:$0x8] }
 0x222   : > { %3921 = vmatmul.mubr.msk.bf16.vlgmr.msra.gmra.mrb[0].mxu1 %vm2222_vm11, %v3660_v51  ;;  %v2401_v43 = vshll.u32 %v2350_v27, 16  ;;  %v4843_v21 = vrot.slane %v2415_v17, 5  ;;  %v3029_v25 = vshrl.u32 %v3010_v28, 16  ;;  %v3042_v32 = vshrl.u32 %v3012_v18, 16  ;;  %v2349_v57 = vld [vmem:[#allocation3 + $0x1c] sm:$0xf] }
 0x223   : > { %3925 = vmatpush3.bf16.xpose.msra.mxu1 %v2294_v63  ;;  %3932 = vmatprep.mubr.msk.bf16.mxu1 %vm4157_vm10, %v4156_v59  ;;  %v2159_v40 = vor.u32 %v2157_v37, %v2156_v19  ;;  %v2193_v44 = vshrl.u32 %v4790_v0, 16  ;;  %v4847_v8 = vrot.slane %v2370_v26, 4  ;;  %v2297_v48 = vsel %vm2222_vm11, %v3667_v31, 0  ;;  %v4879_v14 = vld [vmem:[#allocation3 + $0x40] sm:$0xf] }
 0x224   : > { %3926 = vmatprep.subr.bf16.mxu1 %v4156_v59  ;;  %v4854_v51 = vrot.slane %v2373_v34, 5  ;;  %v2378_v15 = vshrl.u32 %v2347_v41, 16  ;;  %v2381_v45 = vshll.u32 %v2347_v41, 16  ;;  %v2182_v56 = vrot.slane %v2180_v3, 7  ;;  %v4893_v27 = vld [vmem:[#allocation3 + $0x34] sm:$0xf] }
 0x225   : > { %v3718_v22 = vcombine.low %v4841_v12, %v4852_v49  ;;  %v2173_v55 = vsel %vm4306_vm5, %v3657_v42, %v2172_v39  ;;  %v4863_v60 = vrot.slane %v2387_v36, 5  ;;  %v4866_v61 = vrot.slane %v2401_v43, 5  ;;  %v2351_v42 = vld [vmem:[#allocation3 + $0x28] sm:$0xf]  ;;  %v4902_v41 = vld [vmem:[#allocation3 + $0x4c] sm:$0xf] }
 0x226   : > { %v2443_v33 = vshll.u32 %v4849_v29, 16  ;;  %v4869_v2 = vrot.slane %v3029_v25, 11  ;;  %v3055_v52 = vshrl.u32 %v3014_v46, 16  ;;  %v2183_v47 = vshll.u32 %v4785_v62, 16 }
 0x227   : > { %3979 = vmatpush3.bf16.xpose.msra.mxu0 %v2966_v35  ;;  %v2195_v6 = vrot.slane %v2193_v44, 7  ;;  %v2160_v9 = vsel %vm4306_vm5, %v3656_v30, %v2159_v40  ;;  %v2380_v63 = vrot.slane %v2378_v15, 4  ;;  %v2383_v1 = vrot.slane %v2381_v45, 5  ;;  %v3021_v15 = vld [vmem:[#allocation3 + $0x58] sm:$0xf] }
 0x228   : > { %3996 = vmatprep.subr.bf16.mxu0 %v4156_v59  ;;  %v3668_v50 = vcombine.low %v2160_v9, %v2173_v55  ;;  %v4874_v11 = vrot.slane %v3042_v32, 11  ;;  %v2185_v53 = vor.u32 %v2183_v47, %v2182_v56  ;;  %v2196_v54 = vshll.u32 %v4790_v0, 16  ;;  %v2353_v47 = vld [vmem:[#allocation3 + $0x34] sm:$0xf] }
 0x229   : > { %v3226_v13 = vsel %vm2222_vm11, %v3718_v22, 0  ;;  %v3068_v62 = vshrl.u32 %v3016_v5, 16  ;;  %v2376_v30 = vsel %vm4372_vm8, %v4847_v8, %v4854_v51  ;;  %v3081_v17 = vshrl.u32 %v3018_v10, 16 }
 0x22a   : > { %v3094_v18 = vshrl.u32 %v3020_v58, 16  ;;  %v2198_v0 = vor.u32 %v2196_v54, %v2195_v6  ;;  %v3034_v19 = vshrl.u32 %v4841_v12, 16  ;;  %v3047_v7 = vshrl.u32 %v4852_v49, 16 }
 0x22b   : > { %3927 = vmatpush3.bf16.xpose.msra.mxu1 %v2297_v48  ;;  %v4890_v23 = vrot.slane %v3055_v52, 11  ;;  %v2300_v26 = vsel %vm2222_vm11, %v3668_v50, 0  ;;  %v2384_v28 = vor.u32 %v2383_v1, %v2380_v63  ;;  %v2392_v31 = vshrl.u32 %v2349_v57, 16  ;;  %v2355_v48 = vld [vmem:[#allocation3 + $0x40] sm:$0xf] }
 0x22c   : > { %3928 = vmatprep.subr.bf16.mxu1 %v4156_v59  ;;  %v2395_v34 = vshll.u32 %v2349_v57, 16  ;;  %v3719_v36 = vcombine.low %v4893_v27, %v4879_v14  ;;  %v2186_v37 = vsel %vm4306_vm5, %v4831_v16, %v2185_v53  ;;  %v2406_v39 = vshrl.u32 %v2351_v42, 16 }
 0x22d   : > { %v2409_v3 = vshll.u32 %v2351_v42, 16  ;;  %v3037_v35 = vshll.u32 %v4841_v12, 16  ;;  %v4904_v43 = vrot.slane %v3068_v62, 11  ;;  %v4906_v25 = vrot.slane %v3081_v17, 11  ;;  %v4928_v17 = vld [vmem:[#allocation3 + $0x64] sm:$0xf] }
 0x22e   : > { %3981 = vmatmul.mubr.msk.bf16.vlgmr.msra.gmra.mrb[8].mxu0 %vm2222_vm11, %v3697_v4  ;;  %v4908_v32 = vrot.slane %v3094_v18, 11  ;;  %v3036_v40 = vrot.slane %v3034_v19, 7  ;;  %v3049_v44 = vrot.slane %v3047_v7, 7  ;;  %v3060_v46 = vshrl.u32 %v4893_v27, 16 }
 0x22f   : > { %3997 = vmatpush3.bf16.xpose.msra.mxu0 %v3226_v13  ;;  %4004 = vmatprep.mubr.msk.bf16.mxu0 %vm4157_vm10, %v4156_v59  ;;  %v2199_v16 = vsel %vm4306_vm5, %v4836_v20, %v2198_v0  ;;  %v2385_v45 = vrot.slane %v2384_v28, 4  ;;  %v2394_v56 = vrot.slane %v2392_v31, 4  ;;  %v2397_v4 = vrot.slane %v2395_v34, 5 }
 0x230   : > { %3998 = vmatprep.subr.bf16.mxu0 %v4156_v59  ;;  %v3669_v12 = vcombine.low %v2186_v37, %v2199_v16  ;;  %v3073_v22 = vshrl.u32 %v4879_v14, 16  ;;  %v3229_v55 = vsel %vm2222_vm11, %v3719_v36, 0  ;;  %v2408_v5 = vrot.slane %v2406_v39, 4 }
 0x231   : > { %v2411_v52 = vrot.slane %v2409_v3, 5  ;;  %v3050_v6 = vshll.u32 %v4852_v49, 16  ;;  %v3063_v9 = vshll.u32 %v4893_v27, 16  ;;  %v2434_v10 = vshrl.u32 %v2355_v48, 16  ;;  %v4925_v49 = vld [vmem:[#allocation3 + $0x70] sm:$0xf] }
 0x232   : > { %v2437_v20 = vshll.u32 %v2355_v48, 16  ;;  %v3062_v58 = vrot.slane %v3060_v46, 7  ;;  %v3086_v50 = vshrl.u32 %v4902_v41, 16  ;;  %v3099_v63 = vshrl.u32 %v3021_v15, 16 }
 0x233   : > { %3929 = vmatpush3.bf16.xpose.msra.mxu1 %v2300_v26  ;;  %v3720_v1 = vcombine.low %v4902_v41, %v3021_v15  ;;  %v2303_v53 = vsel %vm2222_vm11, %v3669_v12, 0  ;;  %v2390_v54 = vsel %vm4372_vm8, %v2385_v45, %v4863_v60  ;;  %v2398_v13 = vor.u32 %v2397_v4, %v2394_v56  ;;  %v2357_v60 = vld [vmem:[#allocation3 + $0x4c] sm:$0xf] }
 0x234   : > { %3930 = vmatprep.subr.bf16.mxu1 %v4156_v59  ;;  %v2420_v57 = vshrl.u32 %v2353_v47, 16  ;;  %v3075_v62 = vrot.slane %v3073_v22, 7  ;;  %v3076_v42 = vshll.u32 %v4879_v14, 16  ;;  %v2412_v18 = vor.u32 %v2411_v52, %v2408_v5 }
 0x235   : > { %v2423_v0 = vshll.u32 %v2353_v47, 16  ;;  %v3089_v19 = vshll.u32 %v4902_v41, 16  ;;  %v3102_v7 = vshll.u32 %v3021_v15, 16  ;;  %v2436_v26 = vrot.slane %v2434_v10, 4  ;;  %v2095_v41 = vld [vmem:[%s5144_s2] sm:$0xf] }
 0x236   : > { %v2439_v27 = vrot.slane %v2437_v20, 5  ;;  %v3088_v28 = vrot.slane %v3086_v50, 7  ;;  %v3101_v31 = vrot.slane %v3099_v63, 7  ;;  %v3232_v34 = vsel %vm2222_vm11, %v3720_v1, 0 }
 0x237   : > { %3999 = vmatpush3.bf16.xpose.msra.mxu0 %v3229_v55  ;;  %v3672_v14 = vcombine.low %v2376_v30, %v2390_v54  ;;  %v3721_v36 = vcombine.low %v4928_v17, %v4925_v49  ;;  %v2399_v37 = vrot.slane %v2398_v13, 4  ;;  %v2422_v39 = vrot.slane %v2420_v57, 4 }
 0x238   : > { %4000 = vmatprep.subr.bf16.mxu0 %v4156_v59  ;;  %v3039_v3 = vor.u32 %v3037_v35, %v3036_v40  ;;  %v2413_v46 = vrot.slane %v2412_v18, 4  ;;  %v2425_v16 = vrot.slane %v2423_v0, 5  ;;  %v2448_v48 = vshrl.u32 %v2357_v60, 16  ;;  %v2354_v35 = vld [vmem:[#allocation3 + $0x38] sm:$0x1] }
 0x239   : > { %v3052_v12 = vor.u32 %v3050_v6, %v3049_v44  ;;  %v2440_v15 = vor.u32 %v2439_v27, %v2436_v26  ;;  %v3065_v51 = vor.u32 %v3063_v9, %v3062_v58  ;;  %v3078_v30 = vor.u32 %v3076_v42, %v3075_v62  ;;  %v2360_v42 = vld [vmem:[#allocation3 + $0x5c] sm:$0x1] }
 0x23a   : > { %v3040_v8 = vsel %vm4306_vm5, %v4869_v2, %v3039_v3  ;;  %v2491_v45 = vsel %vm2222_vm11, %v3672_v14, 0  ;;  %v3091_v56 = vor.u32 %v3089_v19, %v3088_v28  ;;  %v3104_v4 = vor.u32 %v3102_v7, %v3101_v31  ;;  %v2359_v2 = vld [vmem:[#allocation3 + $0x58] sm:$0xf]  ;;  %v4986_v0 = vld [vmem:[#allocation3 + $0x1c] sm:$0xf] }
 0x23b   : > { %3931 = vmatpush3.bf16.xpose.msra.mxu1 %v2303_v53  ;;  %v3053_v40 = vsel %vm4306_vm5, %v4874_v11, %v3052_v12  ;;  %v2404_v44 = vsel %vm4372_vm8, %v2399_v37, %v4866_v61  ;;  %v3066_v55 = vsel %vm4306_vm5, %v4890_v23, %v3065_v51  ;;  %v3079_v5 = vsel %vm4306_vm5, %v4904_v43, %v3078_v30  ;;  %v2358_v53 = vld [vmem:[#allocation3 + $0x50] sm:$0x1]  ;;  %v3717_v19 = vld [vmem:[%s5144_s2 + $0x1c] sm:$0xf] }
 0x23c   : > { %3936 = vmatprep.subr.bf16.mxu1 %v4156_v59  ;;  %v4955_v22 = vcombine.low %v3040_v8, %v3053_v40  ;;  %v2451_v11 = vshll.u32 %v2357_v60, 16  ;;  %v4965_v52 = vcombine.low %v3066_v55, %v3079_v5  ;;  %v3092_v61 = vsel %vm4306_vm5, %v4906_v25, %v3091_v56  ;;  %v4993_v28 = vld [vmem:[#allocation3 + $0x10] sm:$0xf]  ;;  %v5007_v40 = vld [vmem:[#allocation3 + $0x28] sm:$0xf] }
 0x23d   : > { %v3105_v47 = vsel %vm4306_vm5, %v4908_v32, %v3104_v4  ;;  %v2429_v23 = vshll.u32 %v2354_v35, 16  ;;  %v2418_v43 = vsel %vm4372_vm8, %v2413_v46, %v4843_v21  ;;  %v2426_v9 = vor.u32 %v2425_v16, %v2422_v39  ;;  %v2543_v46 = vld [vmem:[#allocation3 + $0xc] sm:$0x8]  ;;  %v2549_v55 = vld [vmem:[#allocation3 + $0x30] sm:$0x8] }
 0x23e   : > { %v4974_v6 = vcombine.low %v3092_v61, %v3105_v47  ;;  %v2462_v10 = vshrl.u32 %v2359_v2, 16  ;;  %v2465_v20 = vshll.u32 %v2359_v2, 16  ;;  %v3673_v58 = vcombine.low %v2404_v44, %v2418_v43 }
 0x23f   : > { %4001 = vmatpush3.bf16.xpose.msra.mxu0 %v3232_v34  ;;  %v2445_v25 = vrot.slane %v2443_v33, 5  ;;  %v3235_v50 = vsel %vm2222_vm11, %v3721_v36, 0  ;;  %v2441_v63 = vrot.slane %v2440_v15, 4  ;;  %v2450_v32 = vrot.slane %v2448_v48, 4  ;;  %v2545_v36 = vld [vmem:[#allocation3 + $0x18] sm:$0x8] }
 0x240   : > { %4002 = vmatprep.subr.bf16.mxu0 %v4156_v59  ;;  %v2453_v1 = vrot.slane %v2451_v11, 5  ;;  %v2427_v54 = vrot.slane %v2426_v9, 4  ;;  %v2431_v13 = vrot.slane %v2429_v23, 5  ;;  %v2464_v57 = vrot.slane %v2462_v10, 4  ;;  %v5002_v15 = vld [vmem:[#allocation3 + $0x34] sm:$0xf] }
 0x241   : > { %v2467_v62 = vrot.slane %v2465_v20, 5  ;;  %v2494_v21 = vsel %vm2222_vm11, %v3673_v58, 0  ;;  %v2446_v18 = vsel %vm4372_vm8, %v2441_v63, %v2445_v25  ;;  %v2457_v33 = vshll.u32 %v2358_v53, 16  ;;  %v2547_v23 = vld [vmem:[#allocation3 + $0x24] sm:$0x8] }
 0x242   : > { %3933 = vmatmul.mubr.msk.bf16.vlgmr.msra.gmra.mrb[4].mxu1 %vm2222_vm11, %v2095_v41  ;;  %v2454_v29 = vor.u32 %v2453_v1, %v2450_v32  ;;  %v2432_v7 = vsel %vm4372_vm8, %v2427_v54, %v2431_v13  ;;  %v2471_v27 = vshll.u32 %v2360_v42, 16  ;;  %v2580_v14 = vshrl.u32 %v4986_v0, 16  ;;  %v5016_v20 = vld [vmem:[#allocation3 + $0x4c] sm:$0xf]  ;;  %v5021_v1 = vld [vmem:[#allocation3 + $0x40] sm:$0xf] }
 0x243   : > { %3937 = vmatpush3.bf16.xpose.msra.mxu1 %v2491_v45  ;;  %3944 = vmatprep.mubr.msk.bf16.mxu1 %vm4157_vm10, %v4156_v59  ;;  %v2468_v26 = vor.u32 %v2467_v62, %v2464_v57  ;;  %v3674_v60 = vcombine.low %v2432_v7, %v2446_v18  ;;  %v2459_v34 = vrot.slane %v2457_v33, 5  ;;  %v2567_v3 = vshrl.u32 %v4993_v28, 16  ;;  %v3671_v53 = vld [vmem:[%s5144_s2 + $0x8] sm:$0xf] }
 0x244   : > { %3938 = vmatprep.subr.bf16.mxu1 %v4156_v59  ;;  %v2455_v31 = vrot.slane %v2454_v29, 4  ;;  %v2473_v39 = vrot.slane %v2471_v27, 5  ;;  %v2575_v48 = vshrl.u32 %v2545_v36, 16  ;;  %v2582_v12 = vrot.slane %v2580_v14, 7 }
 0x245   : > { %v2469_v37 = vrot.slane %v2468_v26, 4  ;;  %v2497_v41 = vsel %vm2222_vm11, %v3674_v60, 0  ;;  %v2562_v51 = vshrl.u32 %v2543_v46, 16  ;;  %v2569_v30 = vrot.slane %v2567_v3, 7  ;;  %v2558_v60 = vld [vmem:[#allocation3 + $0x64] sm:$0xf] }
 0x246   : > { %v2460_v16 = vsel %vm4372_vm8, %v2455_v31, %v2459_v34  ;;  %v2583_v45 = vshll.u32 %v4986_v0, 16  ;;  %v2570_v56 = vshll.u32 %v4993_v28, 16  ;;  %v3679_v4 = vrot.slane %v2575_v48, 11  ;;  %v2557_v48 = vld [vmem:[#allocation3 + $0x60] sm:$0x8] }
 0x247   : > { %4003 = vmatpush3.bf16.xpose.msra.mxu0 %v3235_v50  ;;  %v2474_v8 = vsel %vm4372_vm8, %v2469_v37, %v2473_v39  ;;  %v2606_v2 = vshrl.u32 %v5002_v15, 16  ;;  %v3678_v5 = vrot.slane %v2562_v51, 11  ;;  %v2593_v61 = vshrl.u32 %v5007_v40, 16  ;;  %v2556_v39 = vld [vmem:[#allocation3 + $0x58] sm:$0xf] }
 0x248   : > { %v3675_v35 = vcombine.low %v2460_v16, %v2474_v8  ;;  %v2585_v44 = vor.u32 %v2583_v45, %v2582_v12  ;;  %v2572_v11 = vor.u32 %v2570_v56, %v2569_v30  ;;  %v2601_v9 = vshrl.u32 %v2549_v55, 16  ;;  %v2555_v45 = vld [vmem:[#allocation3 + $0x54] sm:$0x8] }
 0x249   : > { %v2608_v10 = vrot.slane %v2606_v2, 7  ;;  %v2588_v25 = vshrl.u32 %v2547_v23, 16  ;;  %v2595_v50 = vrot.slane %v2593_v61, 7  ;;  %v2609_v63 = vshll.u32 %v5002_v15, 16 }
 0x24a   : > { %v2500_v47 = vsel %vm2222_vm11, %v3675_v35, 0  ;;  %v2586_v43 = vsel %vm4306_vm5, %v3679_v4, %v2585_v44  ;;  %v2573_v58 = vsel %vm4306_vm5, %v3678_v5, %v2572_v11  ;;  %v2596_v54 = vshll.u32 %v5007_v40, 16 }
 0x24b   : > { %3939 = vmatpush3.bf16.xpose.msra.mxu1 %v2494_v21  ;;  %v3686_v32 = vcombine.low %v2573_v58, %v2586_v43  ;;  %v3681_v13 = vrot.slane %v2601_v9, 11  ;;  %v2611_v57 = vor.u32 %v2609_v63, %v2608_v10  ;;  %v2632_v62 = vshrl.u32 %v5016_v20, 16  ;;  %v2553_v21 = vld [vmem:[#allocation3 + $0x48] sm:$0x8] }
 0x24c   : > { %3940 = vmatprep.subr.bf16.mxu1 %v4156_v59  ;;  %v3680_v42 = vrot.slane %v2588_v25, 11  ;;  %v2598_v18 = vor.u32 %v2596_v54, %v2595_v50  ;;  %v2619_v29 = vshrl.u32 %v5021_v1, 16  ;;  %v2627_v26 = vshrl.u32 %v2553_v21, 16 }
 0x24d   : > { %v2681_v33 = vsel %vm2222_vm11, %v3686_v32, 0  ;;  %v2612_v7 = vsel %vm4306_vm5, %v3681_v13, %v2611_v57  ;;  %v2634_v27 = vrot.slane %v2632_v62, 7  ;;  %v2635_v36 = vshll.u32 %v5016_v20, 16 }
 0x24e   : > { %4005 = vmatmul.mubr.msk.bf16.vlgmr.msra.gmra.mrb[12].mxu0 %vm2222_vm11, %v3717_v19  ;;  %v2551_v19 = vld [vmem:[#allocation3 + $0x3c] sm:$0x8]  ;;  %v2599_v31 = vsel %vm4306_vm5, %v3680_v42, %v2598_v18  ;;  %v2621_v14 = vrot.slane %v2619_v29, 7  ;;  %v2622_v3 = vshll.u32 %v5021_v1, 16  ;;  %v2658_v16 = vshrl.u32 %v2558_v60, 16 }
 0x24f   : > { %v2614_v34 = vshrl.u32 %v2551_v19, 16  ;;  %v3687_v37 = vcombine.low %v2599_v31, %v2612_v7  ;;  %v2637_v46 = vor.u32 %v2635_v36, %v2634_v27  ;;  %v2645_v51 = vshrl.u32 %v2556_v39, 16  ;;  %v3024_v42 = vld [vmem:[#allocation3 + $0x6c] sm:$0x8]  ;;  %v3022_v18 = vld [vmem:[#allocation3 + $0x60] sm:$0x8] }
 0x250   : > { %v2624_v8 = vor.u32 %v2622_v3, %v2621_v14  ;;  %v2653_v56 = vshrl.u32 %v2557_v48, 16  ;;  %v2660_v4 = vrot.slane %v2658_v16, 7  ;;  %v2640_v2 = vshrl.u32 %v2555_v45, 16  ;;  %v3278_v29 = vld [vmem:[#allocation3 + $0x1c] sm:$0xf] }
 0x251   : > { %v3682_v12 = vrot.slane %v2614_v34, 11  ;;  %v2684_v30 = vsel %vm2222_vm11, %v3687_v37, 0  ;;  %v2647_v55 = vrot.slane %v2645_v51, 7  ;;  %v2661_v5 = vshll.u32 %v2558_v60, 16  ;;  %v3284_v48 = vld [vmem:[#allocation3 + $0x40] sm:$0xf] }
 0x252   : > { %v2648_v61 = vshll.u32 %v2556_v39, 16  ;;  %v3684_v43 = vrot.slane %v2640_v2, 11  ;;  %v3692_v32 = vcombine.low %v4993_v28, %v4986_v0  ;;  %v3693_v13 = vcombine.low %v5007_v40, %v5002_v15  ;;  %v3691_v15 = vld [vmem:[%s5144_s2 + $0x10] sm:$0xf]  ;;  %v3281_v45 = vld [vmem:[#allocation3 + $0x2c] sm:$0x1] }
 0x253   : > { %3941 = vmatpush3.bf16.xpose.msra.mxu1 %v2497_v41  ;;  %v3683_v41 = vrot.slane %v2627_v26, 11  ;;  %v2625_v44 = vsel %vm4306_vm5, %v3682_v12, %v2624_v8  ;;  %v2663_v23 = vor.u32 %v2661_v5, %v2660_v4  ;;  %v3694_v0 = vcombine.low %v5021_v1, %v5016_v20  ;;  %v3280_v26 = vld [vmem:[#allocation3 + $0x28] sm:$0xf] }
 0x254   : > { %3942 = vmatprep.subr.bf16.mxu1 %v4156_v59  ;;  %v2650_v9 = vor.u32 %v2648_v61, %v2647_v55  ;;  %v2759_v54 = vsel %vm2222_vm11, %v3692_v32, 0  ;;  %v2762_v57 = vsel %vm2222_vm11, %v3693_v13, 0  ;;  %v3695_v62 = vcombine.low %v2556_v39, %v2558_v60 }
 0x255   : > { %v2638_v35 = vsel %vm4306_vm5, %v3683_v41, %v2637_v46  ;;  %v2765_v28 = vsel %vm2222_vm11, %v3694_v0, 0  ;;  %v3148_v40 = vsel %vm2222_vm11, %v4955_v22, 0  ;;  %v3125_v20 = vshrl.u32 %v4925_v49, 16  ;;  %v3279_v46 = vld [vmem:[#allocation3 + $0x20] sm:$0x1] }
 0x256   : > { %v3688_v11 = vcombine.low %v2625_v44, %v2638_v35  ;;  %v2651_v25 = vsel %vm4306_vm5, %v3684_v43, %v2650_v9  ;;  %v2768_v21 = vsel %vm2222_vm11, %v3695_v62, 0  ;;  %v3112_v1 = vshrl.u32 %v4928_v17, 16  ;;  %v3282_v35 = vld [vmem:[#allocation3 + $0x34] sm:$0xf]  ;;  %v3285_v43 = vld [vmem:[#allocation3 + $0x44] sm:$0x1] }
 0x257   : > { %v3128_v19 = vshll.u32 %v4925_v49, 16  ;;  %v3151_v7 = vsel %vm2222_vm11, %v4965_v52, 0  ;;  %v3120_v22 = vshrl.u32 %v3024_v42, 16  ;;  %v3107_v60 = vshrl.u32 %v3022_v18, 16 }
 0x258   : > { %v2687_v10 = vsel %vm2222_vm11, %v3688_v11, 0  ;;  %v3114_v27 = vrot.slane %v3112_v1, 7  ;;  %v3297_v31 = vshrl.u32 %v3278_v29, 16  ;;  %v3300_v34 = vshll.u32 %v3278_v29, 16  ;;  %v3287_v29 = vld [vmem:[#allocation3 + $0x50] sm:$0x1] }
 0x259   : > { %v3115_v14 = vshll.u32 %v4928_v17, 16  ;;  %v3311_v36 = vshrl.u32 %v3280_v26, 16  ;;  %v3314_v37 = vshll.u32 %v3280_v26, 16  ;;  %v3711_v39 = vrot.slane %v3120_v22, 11 }
 0x25a   : > { %v3710_v41 = vrot.slane %v3107_v60, 11  ;;  %v3299_v16 = vrot.slane %v3297_v31, 4  ;;  %v3302_v52 = vrot.slane %v3300_v34, 5  ;;  %v3154_v51 = vsel %vm2222_vm11, %v4974_v6, 0  ;;  %v3290_v60 = vld [vmem:[#allocation3 + $0x64] sm:$0xf] }
 0x25b   : > { %3943 = vmatpush3.bf16.xpose.msra.mxu1 %v2500_v47  ;;  %v3685_v47 = vrot.slane %v2653_v56, 11  ;;  %v3117_v49 = vor.u32 %v3115_v14, %v3114_v27  ;;  %v3313_v12 = vrot.slane %v3311_v36, 4  ;;  %v3316_v8 = vrot.slane %v3314_v37, 5 }
 0x25c   : > { %3948 = vmatprep.subr.bf16.mxu1 %v4156_v59  ;;  %v3306_v17 = vshll.u32 %v3279_v46, 16  ;;  %v3303_v4 = vor.u32 %v3302_v52, %v3299_v16  ;;  %v3339_v44 = vshrl.u32 %v3284_v48, 16  ;;  %v3342_v2 = vshll.u32 %v3284_v48, 16 }
 0x25d   : > { %v2664_v58 = vsel %vm4306_vm5, %v3685_v47, %v2663_v23  ;;  %v3118_v56 = vsel %vm4306_vm5, %v3710_v41, %v3117_v49  ;;  %v3317_v55 = vor.u32 %v3316_v8, %v3313_v12  ;;  %v3320_v5 = vshll.u32 %v3281_v45, 16 }
 0x25e   : > { %v3689_v50 = vcombine.low %v2651_v25, %v2664_v58  ;;  %v3325_v11 = vshrl.u32 %v3282_v35, 16  ;;  %v3328_v61 = vshll.u32 %v3282_v35, 16  ;;  %v3308_v47 = vrot.slane %v3306_v17, 5  ;;  %v3286_v58 = vld [vmem:[#allocation3 + $0x4c] sm:$0xf] }
 0x25f   : > { %v3304_v23 = vrot.slane %v3303_v4, 4  ;;  %v3341_v9 = vrot.slane %v3339_v44, 4  ;;  %v3318_v25 = vrot.slane %v3317_v55, 4  ;;  %v3348_v13 = vshll.u32 %v3285_v43, 16  ;;  %v3291_v4 = vld [vmem:[#allocation3 + $0x68] sm:$0x1] }
 0x260   : > { %v2690_v63 = vsel %vm2222_vm11, %v3689_v50, 0  ;;  %v3322_v50 = vrot.slane %v3320_v5, 5  ;;  %v3327_v32 = vrot.slane %v3325_v11, 4  ;;  %v3353_v62 = vshrl.u32 %v3286_v58, 16  ;;  %v3293_v55 = vld [vmem:[#allocation3 + $0x74] sm:$0x1] }
 0x261   : > { %v3309_v0 = vsel %vm4372_vm8, %v3304_v23, %v3308_v47  ;;  %v3350_v22 = vrot.slane %v3348_v13, 5  ;;  %v3381_v52 = vshrl.u32 %v3290_v60, 16  ;;  %v3384_v48 = vshll.u32 %v3290_v60, 16 }
 0x262   : > { %3945 = vmatmul.mubr.msk.bf16.vlgmr.msra.gmra.mrb[8].mxu1 %vm2222_vm11, %v3671_v53  ;;  %v3677_v53 = vld [vmem:[%s5144_s2 + $0xc] sm:$0xf]  ;;  %v3355_v26 = vrot.slane %v3353_v62, 4 }
 0x263   : > { %3949 = vmatpush3.bf16.xpose.msra.mxu1 %v2681_v33  ;;  %3956 = vmatprep.mubr.msk.bf16.mxu1 %vm4157_vm10, %v4156_v59  ;;  %v3127_v33 = vrot.slane %v3125_v20, 7  ;;  %v3383_v44 = vrot.slane %v3381_v52, 4 }
 0x264   : > { %3950 = vmatprep.subr.bf16.mxu1 %v4156_v59 }
 0x265   : > { %v3130_v3 = vor.u32 %v3128_v19, %v3127_v33  ;;  %v3292_v33 = vld [vmem:[#allocation3 + $0x70] sm:$0xf]  ;;  %v3703_v19 = vld [vmem:[%s5144_s2 + $0x18] sm:$0xf] }
 0x266   : > { %v3395_v41 = vshrl.u32 %v3292_v33, 16  ;;  %v3398_v49 = vshll.u32 %v3292_v33, 16 }
 0x268   : > { %v3397_v45 = vrot.slane %v3395_v41, 4  ;;  %v3400_v17 = vrot.slane %v3398_v49, 5 }
 0x26a   : > { %v3401_v43 = vor.u32 %v3400_v17, %v3397_v45 }
 0x26b   : > { %3951 = vmatpush3.bf16.xpose.msra.mxu1 %v2684_v30  ;;  %v3131_v30 = vsel %vm4306_vm5, %v3711_v39, %v3130_v3  ;;  %v3289_v39 = vld [vmem:[#allocation3 + $0x5c] sm:$0x1]  ;;  %v3362_v3 = vshll.u32 %v3287_v29, 16 }
 0x26c   : > { %3952 = vmatprep.subr.bf16.mxu1 %v4156_v59  ;;  %v3715_v6 = vcombine.low %v3118_v56, %v3131_v30 }
 0x26d   : > { %v3364_v56 = vrot.slane %v3362_v3, 5 }
 0x273   : > { %3953 = vmatpush3.bf16.xpose.msra.mxu1 %v2687_v10  ;;  %v3344_v10 = vrot.slane %v3342_v2, 5  ;;  %v3386_v2 = vrot.slane %v3384_v48, 5 }
 0x274   : > { %3954 = vmatprep.subr.bf16.mxu1 %v4156_v59 }
 0x275   : > { %v3387_v23 = vor.u32 %v3386_v2, %v3383_v44 }
 0x27b   : > { %3955 = vmatpush3.bf16.xpose.msra.mxu1 %v2690_v63  ;;  %v3283_v63 = vld [vmem:[#allocation3 + $0x38] sm:$0x1] }
 0x27c   : > { %3960 = vmatprep.subr.bf16.mxu1 %v4156_v59 }
 0x282   : > { %3957 = vmatmul.mubr.msk.bf16.vlgmr.msra.gmra.mrb[12].mxu1 %vm2222_vm11, %v3677_v53  ;;  %v3330_v53 = vrot.slane %v3328_v61, 5 }
 0x283   : > { %3961 = vmatpush3.bf16.xpose.msra.mxu1 %v2759_v54  ;;  %3968 = vmatprep.mubr.msk.bf16.mxu1 %vm4157_vm10, %v4156_v59  ;;  %v3157_v54 = vsel %vm2222_vm11, %v3715_v6, 0  ;;  %v3390_v6 = vshll.u32 %v3291_v4, 16  ;;  %v3480_v4 = vpop.permute.xlu1 %3479 }
 0x284   : > { %3962 = vmatprep.subr.bf16.mxu1 %v4156_v59  ;;  %v3331_v20 = vor.u32 %v3330_v53, %v3327_v32 }
 0x286   : > { %v3332_v31 = vrot.slane %v3331_v20, 4 }
 0x28b   : > { %3963 = vmatpush3.bf16.xpose.msra.mxu1 %v2762_v57  ;;  %v3288_v57 = vld [vmem:[#allocation3 + $0x58] sm:$0xf] }
 0x28c   : > { %3964 = vmatprep.subr.bf16.mxu1 %v4156_v59  ;;  %v3367_v1 = vshrl.u32 %v3288_v57, 16  ;;  %v3370_v42 = vshll.u32 %v3288_v57, 16 }
 0x28e   : > { %v3369_v14 = vrot.slane %v3367_v1, 4  ;;  %v3372_v36 = vrot.slane %v3370_v42, 5 }
 0x290   : > { %v3373_v8 = vor.u32 %v3372_v36, %v3369_v14 }
 0x292   : > { %v3374_v5 = vrot.slane %v3373_v8, 4 }
 0x293   : > { %3965 = vmatpush3.bf16.xpose.msra.mxu1 %v2765_v28  ;;  %v3345_v28 = vor.u32 %v3344_v10, %v3341_v9  ;;  %v3404_v9 = vshll.u32 %v3293_v55, 16 }
 0x294   : > { %3966 = vmatprep.subr.bf16.mxu1 %v4156_v59 }
 0x29b   : > { %3967 = vmatpush3.bf16.xpose.msra.mxu1 %v2768_v21  ;;  %v3356_v21 = vshll.u32 %v3286_v58, 16  ;;  %v3388_v58 = vrot.slane %v3387_v23, 4 }
 0x29c   : > { %3984 = vmatprep.subr.bf16.mxu1 %v4156_v59 }
 0x29d   : > { %v3358_v27 = vrot.slane %v3356_v21, 5 }
 0x29f   : > { %v3359_v16 = vor.u32 %v3358_v27, %v3355_v26 }
 0x2a1   : > { %v3360_v35 = vrot.slane %v3359_v16, 4 }
 0x2a2   : > { %3969 = vmatmul.mubr.msk.bf16.vlgmr.msra.gmra.mrb[16].mxu1 %vm2222_vm11, %v3691_v15  ;;  %v3334_v15 = vshll.u32 %v3283_v63, 16  ;;  %v3406_v63 = vrot.slane %v3404_v9, 5 }
 0x2a3   : > { %3985 = vmatpush3.bf16.xpose.msra.mxu1 %v3148_v40  ;;  %3992 = vmatprep.mubr.msk.bf16.mxu1 %vm4157_vm10, %v4156_v59  ;;  %v3323_v40 = vsel %vm4372_vm8, %v3318_v25, %v3322_v50  ;;  %v3365_v47 = vsel %vm4372_vm8, %v3360_v35, %v3364_v56  ;;  %v3392_v25 = vrot.slane %v3390_v6, 5  ;;  %v3402_v50 = vrot.slane %v3401_v43, 4 }
 0x2a4   : > { %3986 = vmatprep.subr.bf16.mxu1 %v4156_v59  ;;  %v3724_v18 = vcombine.low %v3309_v0, %v3323_v40  ;;  %v3336_v34 = vrot.slane %v3334_v15, 5  ;;  %v3723_v0 = vld [vmem:[%s5144_s2 + $0x20] sm:$0xf] }
 0x2a5   : > { %v3393_v53 = vsel %vm4372_vm8, %v3388_v58, %v3392_v25 }
 0x2a6   : > { %v3424_v37 = vsel %vm2222_vm11, %v3724_v18, 0  ;;  %v3337_v12 = vsel %vm4372_vm8, %v3332_v31, %v3336_v34 }
 0x2ab   : > { %3987 = vmatpush3.bf16.xpose.msra.mxu1 %v3151_v7  ;;  %v3346_v7 = vrot.slane %v3345_v28, 4 }
 0x2ac   : > { %3988 = vmatprep.subr.bf16.mxu1 %v4156_v59 }
 0x2ad   : > { %v3351_v46 = vsel %vm4372_vm8, %v3346_v7, %v3350_v22 }
 0x2ae   : > { %v3725_v30 = vcombine.low %v3337_v12, %v3351_v46 }
 0x2b0   : > { %v3427_v61 = vsel %vm2222_vm11, %v3725_v30, 0 }
 0x2b3   : > { %3989 = vmatpush3.bf16.xpose.msra.mxu1 %v3154_v51  ;;  %v3376_v51 = vshll.u32 %v3289_v39, 16 }
 0x2b4   : > { %3990 = vmatprep.subr.bf16.mxu1 %v4156_v59 }
 0x2b5   : > { %v3378_v11 = vrot.slane %v3376_v51, 5 }
 0x2b7   : > { %v3379_v10 = vsel %vm4372_vm8, %v3374_v5, %v3378_v11 }
 0x2b8   : > { %v3726_v24 = vcombine.low %v3365_v47, %v3379_v10 }
 0x2ba   : > { %v3430_v32 = vsel %vm2222_vm11, %v3726_v24, 0 }
 0x2bb   : > { %3991 = vmatpush3.bf16.xpose.msra.mxu1 %v3157_v54  ;;  %v3407_v54 = vsel %vm4372_vm8, %v3402_v50, %v3406_v63 }
 0x2bc   : > { %4008 = vmatprep.subr.bf16.mxu1 %v4156_v59  ;;  %v3727_v13 = vcombine.low %v3393_v53, %v3407_v54 }
 0x2be   : > { %v3433_v57 = vsel %vm2222_vm11, %v3727_v13, 0 }
 0x2c2   : > { %3993 = vmatmul.mubr.msk.bf16.vlgmr.msra.gmra.mrb[20].mxu1 %vm2222_vm11, %v3703_v19 }
 0x2c3   : > { %4009 = vmatpush3.bf16.xpose.msra.mxu1 %v3424_v37  ;;  %4016 = vmatprep.mubr.msk.bf16.mxu1 %vm4157_vm10, %v4156_v59 }
 0x2c4   : > { %4010 = vmatprep.subr.bf16.mxu1 %v4156_v59 }
 0x2cb   : > { %4011 = vmatpush3.bf16.xpose.msra.mxu1 %v3427_v61 }
 0x2cc   : > { %4012 = vmatprep.subr.bf16.mxu1 %v4156_v59 }
 0x2d3   : > { %4013 = vmatpush3.bf16.xpose.msra.mxu1 %v3430_v32 }
 0x2d4   : > { %4014 = vmatprep.subr.bf16.mxu1 %v4156_v59 }
 0x2db   : > { %4015 = vmatpush3.bf16.xpose.msra.mxu1 %v3433_v57 }
 0x2e2   : > { %4017 = vmatmul.mubr.msk.bf16.vlgmr.msra.gmra.mrb[24].mxu1 %vm2222_vm11, %v3723_v0 }
 0x2f5   : > { %v2272_v28 = vpop.f32.mrb[0].mxu1 }
 0x2f6   : > { %v3922_v62 = vpop.f32.mrb[1].mxu1 }
 0x2f7   : > { %v2275_v21 = vpop.f32.mrb[2].mxu1 }
 0x2f8   : > { %v3923_v15 = vpop.f32.mrb[3].mxu1 }
 0x301   : > { %v3002_v40 = vpop.f32.mrb[8].mxu0 }
 0x302   : > { %v3982_v20 = vpop.f32.mrb[9].mxu0 }
 0x303   : > { %v3005_v38 = vpop.f32.mrb[10].mxu0 }
 0x304   : > { %v3983_v1 = vpop.f32.mrb[11].mxu0 }
 0x315   : > { %v2339_v42 = vpop.f32.mrb[4].mxu1 }
 0x316   : > { %v2340_v59 = vadd.f32 %v2339_v42, %v2272_v28  ;;  %v3934_v18 = vpop.f32.mrb[5].mxu1 }
 0x317   : > { %v2342_v29 = vpop.f32.mrb[6].mxu1 }
 0x318   : > { %v3935_v33 = vpop.f32.mrb[7].mxu1 }
 0x321   : > { %v3271_v19 = vpop.f32.mrb[12].mxu0 }
 0x322   : > { %v4006_v7 = vpop.f32.mrb[13].mxu0 }
 0x323   : > { %v3274_v22 = vpop.f32.mrb[14].mxu0 }
 0x324   : > { %v4007_v26 = vpop.f32.mrb[15].mxu0 }
 0x335   : > { %v2536_v27 = vpop.f32.mrb[8].mxu1 }
 0x336   : > { %v2542_v60 = vadd.f32 %v2536_v27, %v2340_v59  ;;  %v3946_v31 = vpop.f32.mrb[9].mxu1 }
 0x337   : > { %v2539_v34 = vpop.f32.mrb[10].mxu1 }
 0x338   : > { %v3947_v14 = vpop.f32.mrb[11].mxu1 }
 0x355   : > { %v2726_v36 = vpop.f32.mrb[12].mxu1 }
 0x356   : > { %v2732_v37 = vadd.f32 %v2726_v36, %v2542_v60  ;;  %v3958_v39 = vpop.f32.mrb[13].mxu1 }
 0x357   : > { %v2729_v3 = vpop.f32.mrb[14].mxu1 }
 0x358   : > { %v3959_v41 = vpop.f32.mrb[15].mxu1 }
 0x375   : > { %v2804_v49 = vpop.f32.mrb[16].mxu1 }
 0x376   : > { %v2810_v46 = vadd.f32 %v2804_v49, %v2732_v37  ;;  %v3970_v16 = vpop.f32.mrb[17].mxu1 }
 0x377   : > { %v2807_v52 = vpop.f32.mrb[18].mxu1 }
 0x378   : > { %v3008_v48 = vadd.f32 %v3002_v40, %v2810_v46  ;;  %v3971_v12 = vpop.f32.mrb[19].mxu1 }
 0x395   : > { %v3193_v8 = vpop.f32.mrb[20].mxu1 }
 0x396   : > { %v3199_v51 = vadd.f32 %v3193_v8, %v3008_v48  ;;  %v3994_v30 = vpop.f32.mrb[21].mxu1 }
 0x397   : > { %v3196_v45 = vpop.f32.mrb[22].mxu1 }
 0x398   : > { %v3277_v17 = vadd.f32 %v3271_v19, %v3199_v51  ;;  %v3995_v35 = vpop.f32.mrb[23].mxu1 }
 0x3b5   : > { %v3469_v56 = vpop.f32.mrb[24].mxu1 }
 0x3b6   : > { %v3475_v44 = vadd.f32 %v3469_v56, %v3277_v17  ;;  %v4018_v2 = vpop.f32.mrb[25].mxu1 }
 0x3b7   : > { %v3472_v55 = vpop.f32.mrb[26].mxu1 }
 0x3b8   : > { %v3482_v5 = vadd.f32 %v3480_v4, %v3475_v44  ;;  %v4019_v11 = vpop.f32.mrb[27].mxu1 }
 0x3ba   : > { %v3483_v61 = vmax.f32 %v3482_v5, 0.0 }
 0x3bc   : > { %3485 = vst.msk [vmem:[%s222_s22] sm:$0xff] %vm3484_vm12, %v3483_v61 }
 0x3bd PF: > { %s15_s18 = sadd.s32 1, %s4152_s18  }
 0x3be   : > { %p12_p4 = scmp.ge.s32.totalorder %s15_s18, 4  }
 0x3c0   :  { %14 = sbr.rel (!%p12_p4) target bundleno = 1 (0x1), region = 92 }

</bundles_post_ra>
